<compile_context>
chip_gen: v6e
topology: v6e:2x2x1
jax: 0.10.0
libtpu: 0.0.40
codegen_flags: <defaults>
</compile_context>

<pallas_src>
import jax
import jax.numpy as jnp
from jax import lax
from jax.experimental import pallas as pl
from jax.experimental.pallas import tpu as pltpu


# ---------------------------------------------------------------------------
# Pallas kernel: one tile of the flat (already downsampled, planar-BGR) texture.
# ---------------------------------------------------------------------------
def _flametex_kernel(texcode_ref, basis_ref, mean_ref, out_ref):
    # texcode_ref: (B, P)   full block, resident across the grid
    # basis_ref:   (TN, P)  tile of the preprocessed texture basis
    # mean_ref:    (1, TN)  tile of the preprocessed texture mean (f32)
    # out_ref:     (B, TN)  tile of the flat output texture
    code = texcode_ref[...].astype(basis_ref.dtype)
    # Contract P of (B, P) with P of (TN, P) -> (B, TN); no explicit transpose.
    tex = lax.dot_general(
        code,
        basis_ref[...],
        dimension_numbers=(((1,), (1,)), ((), ())),
        preferred_element_type=jnp.float32,
    )
    out_ref[...] = tex + mean_ref[...]


# ---------------------------------------------------------------------------
# One-time "model load" preprocessing of the constant buffers.
# Folds: ::2 nearest downsample, NHWC->NCHW permute, RGB->BGR flip.
# ---------------------------------------------------------------------------
def preprocess_tex_space(texture_mean, texture_basis, tex_h, *, basis_dtype=jnp.float32):
    """texture_mean: (N,) f32, texture_basis: (N, P) f32 with N = tex_h*tex_h*3
    (flat row-major H, W, C order as in the PyTorch module).

    Returns:
      basis_p: (N_out, P) basis_dtype, mean_p: (1, N_out) f32
    with N_out = 3 * (tex_h//2)**2 laid out channel-planar in BGR order, so the
    kernel's flat output reshapes directly to NCHW (B, 3, H/2, W/2) BGR.
    """
    P = texture_basis.shape[1]
    h2 = tex_h // 2
    n_out = 3 * h2 * h2

    basis = texture_basis.reshape(tex_h, tex_h, 3, P)[::2, ::2]   # (h2, h2, 3, P)
    basis = jnp.transpose(basis, (2, 0, 1, 3))[::-1]              # (3 BGR, h2, h2, P)
    basis = basis.reshape(n_out, P).astype(basis_dtype)

    mean = texture_mean.reshape(tex_h, tex_h, 3)[::2, ::2]        # (h2, h2, 3)
    mean = jnp.transpose(mean, (2, 0, 1))[::-1]                   # (3 BGR, h2, h2)
    mean = mean.reshape(1, n_out).astype(jnp.float32)
    return basis, mean


def _pick_tile(n_out, requested):
    """Largest multiple of 128 that divides n_out and is <= requested."""
    best = 128
    for cand in range(128, min(requested, n_out) + 1, 128):
        if n_out % cand == 0:
            best = cand
    return best


# ---------------------------------------------------------------------------
# Forward pass on the preprocessed buffers.
# ---------------------------------------------------------------------------
def flametex_forward(texcode, basis_p, mean_p, tex_h, *, tn=8192):
    """texcode: (B, P) f32; basis_p/mean_p from preprocess_tex_space.

    Returns NCHW texture (B, 3, tex_h//2, tex_h//2), BGR channel order,
    matching PyTorch FLAMETex.forward.
    """
    B, P = texcode.shape
    h2 = tex_h // 2
    n_out = 3 * h2 * h2
    assert basis_p.shape == (n_out, P), basis_p.shape
    assert mean_p.shape == (1, n_out), mean_p.shape
    assert n_out % 128 == 0

    tn = _pick_tile(n_out, tn)

    # Double-buffered VMEM footprint: basis tile + mean tile + output tile.
    itemsize = jnp.dtype(basis_p.dtype).itemsize
    vmem_needed = 2 * (tn * P * itemsize + tn * 4 + B * tn * 4) + (4 << 20)
    vmem_limit = int(max(vmem_needed, 32 << 20))

    flat = pl.pallas_call(
        _flametex_kernel,
        out_shape=jax.ShapeDtypeStruct((B, n_out), jnp.float32),
        grid_spec=pltpu.PrefetchScalarGridSpec(
            num_scalar_prefetch=0,
            grid=(n_out // tn,),
            in_specs=[
                pl.BlockSpec((B, P), lambda j: (0, 0)),    # texcode (whole, resident)
                pl.BlockSpec((tn, P), lambda j: (j, 0)),   # basis tile
                pl.BlockSpec((1, tn), lambda j: (0, j)),   # mean tile
            ],
            out_specs=pl.BlockSpec((B, tn), lambda j: (0, j)),
        ),
        compiler_params=pltpu.CompilerParams(
            dimension_semantics=("parallel",),
            vmem_limit_bytes=vmem_limit,
        ),
    )(texcode, basis_p, mean_p)

    # Output is already downsampled, channel-planar BGR: just reshape to NCHW.
    return flat.reshape(B, 3, h2, h2)


# ---------------------------------------------------------------------------
# Pure-JAX reference mirroring the PyTorch code literally (full-res compute,
# then permute / nearest-downsample / BGR flip).
# ---------------------------------------------------------------------------
def flametex_reference(texcode, texture_basis, texture_mean, tex_h):
    B = texcode.shape[0]
    tex = texture_mean[None, None, :] + jnp.sum(
        texture_basis[None, :, :] * texcode[:, None, :], axis=-1
    )
    tex = tex.reshape(B, tex_h, tex_h, 3)
    tex = jnp.transpose(tex, (0, 3, 1, 2))
    tex = tex[:, :, ::2, ::2]     # F.interpolate(..., [H//2, H//2]) nearest
    tex = tex[:, ::-1, :, :]      # channels [2, 1, 0]
    return tex


if __name__ == "__main__":
    # Small synthetic sizes (real model: tex_h=512, tex_params up to 200).
    B = 2
    TEX_PARAMS = 16
    TEX_H = 64
    N = TEX_H * TEX_H * 3  # 12288

    key = jax.random.PRNGKey(0)
    k_mean, k_basis, k_code = jax.random.split(key, 3)

    # Deterministic synthetic "tex space" (stands in for the .npz buffers).
    texture_mean = jax.random.uniform(k_mean, (N,), jnp.float32) * 255.0
    texture_basis = jax.random.normal(k_basis, (N, TEX_PARAMS), jnp.float32)
    texcode = jax.random.normal(k_code, (B, TEX_PARAMS), jnp.float32)

    # One-time load-time preprocessing (downsample + NCHW + BGR folded in).
    basis_p, mean_p = preprocess_tex_space(texture_mean, texture_basis, TEX_H)

    out = flametex_forward(texcode, basis_p, mean_p, TEX_H)
    out = jax.block_until_ready(out)

    ref = flametex_reference(texcode, texture_basis, texture_mean, TEX_H)
    assert out.shape == (B, 3, TEX_H // 2, TEX_H // 2), out.shape
    assert jnp.allclose(out, ref, atol=1e-3, rtol=1e-4), float(
        jnp.max(jnp.abs(out - ref))
    )

    # Optional bf16-basis variant: halves HBM traffic on the only hot buffer;
    # matmul still accumulates in f32 via preferred_element_type.
    basis_bf16, mean_p2 = preprocess_tex_space(
        texture_mean, texture_basis, TEX_H, basis_dtype=jnp.bfloat16
    )
    out_bf16 = jax.block_until_ready(
        flametex_forward(texcode, basis_bf16, mean_p2, TEX_H)
    )
    assert jnp.allclose(out_bf16, ref, atol=2.0, rtol=2e-2), float(
        jnp.max(jnp.abs(out_bf16 - ref))
    )

    print("KERNEL_OK")
</pallas_src>

<mosaic_0001>
module attributes {stable_mosaic.version = 11 : i64} {
  func.func @_flametex_kernel(%arg0: i32, %arg1: memref<2x16xf32, #tpu.memory_space<vmem>>, %arg2: memref<3072x16xf32, #tpu.memory_space<vmem>>, %arg3: memref<1x3072xf32, #tpu.memory_space<vmem>>, %arg4: memref<2x3072xf32, #tpu.memory_space<vmem>>) attributes {dimension_semantics = [#tpu.dimension_semantics<parallel>], iteration_bounds = array<i64: 1>, scalar_prefetch = 0 : i64, scratch_operands = 0 : i64, tpu.core_type = #tpu.core_type<tc>, window_params = [{pipeline_mode = #tpu.pipeline_mode<synchronous>, transform_indices = @transform_0, window_bounds = array<i64: 2, 16>}, {transform_indices = @transform_1, window_bounds = array<i64: 3072, 16>}, {transform_indices = @transform_2, window_bounds = array<i64: 1, 3072>}, {transform_indices = @transform_3, window_bounds = array<i64: 2, 3072>}]} {
    %c0 = arith.constant 0 : index
    %c0_0 = arith.constant 0 : index
    %0 = vector.load %arg1[%c0, %c0_0] : memref<2x16xf32, #tpu.memory_space<vmem>>, vector<2x16xf32>
    %c0_1 = arith.constant 0 : index
    %c0_2 = arith.constant 0 : index
    %1 = vector.load %arg2[%c0_1, %c0_2] : memref<3072x16xf32, #tpu.memory_space<vmem>>, vector<3072x16xf32>
    %cst = arith.constant dense<0.000000e+00> : vector<2x3072xf32>
    %2 = tpu.matmul %0, %1, %cst {dimension_numbers = #tpu.dot_dimension_numbers<[1], [1], [0], [0], [0, 0, 1, 0], [], []>} : vector<2x16xf32>, vector<3072x16xf32>, vector<2x3072xf32> -> vector<2x3072xf32>
    %c0_3 = arith.constant 0 : index
    %c0_4 = arith.constant 0 : index
    %3 = vector.load %arg3[%c0_3, %c0_4] : memref<1x3072xf32, #tpu.memory_space<vmem>>, vector<1x3072xf32>
    %4 = vector.broadcast %3 : vector<1x3072xf32> to vector<2x3072xf32>
    %5 = arith.addf %2, %4 : vector<2x3072xf32>
    %c0_5 = arith.constant 0 : index
    %c0_6 = arith.constant 0 : index
    %6 = vector.load %arg4[%c0_5, %c0_6] : memref<2x3072xf32, #tpu.memory_space<vmem>>, vector<2x3072xf32>
    tpu.vector_store %arg4[%c0_5, %c0_6], %5 {strides = array<i32>} : memref<2x3072xf32, #tpu.memory_space<vmem>>, vector<2x3072xf32>,
    return
  }
  func.func @transform_0(%arg0: i32) -> (i32, i32) {
    %c0_i32 = arith.constant 0 : i32
    %c0_i32_0 = arith.constant 0 : i32
    %c0_i32_1 = arith.constant 0 : i32
    return %c0_i32, %c0_i32_0 : i32, i32
  }
  func.func @transform_1(%arg0: i32) -> (i32, i32) {
    %c0_i32 = arith.constant 0 : i32
    %c0_i32_0 = arith.constant 0 : i32
    return %arg0, %c0_i32 : i32, i32
  }
  func.func @transform_2(%arg0: i32) -> (i32, i32) {
    %c0_i32 = arith.constant 0 : i32
    %c0_i32_0 = arith.constant 0 : i32
    return %c0_i32, %arg0 : i32, i32
  }
  func.func @transform_3(%arg0: i32) -> (i32, i32) {
    %c0_i32 = arith.constant 0 : i32
    %c0_i32_0 = arith.constant 0 : i32
    return %c0_i32, %arg0 : i32, i32
  }
}

</mosaic_0001>

<bundles_post_ra>
// kernel: tpu_custom_call.1
= control target key start
LH: loop header
LB: loop body
LE: loop exit
PB: predicated region body
PF: predicated region fallthrough
CT: control target
= control target key end

     0   :  { %vm526_vm0 = vcmask 130048   ;;  %s5218_s0 = inlined_call_operand.vmem [shape: f32[2,16], index: 0, kind: input, shape index: {}]   ;;  %s5219_s1 = inlined_call_operand.vmem [shape: f32[3072,16], index: 1, kind: input, shape index: {}]   ;;  %s5220_s2 = inlined_call_operand.vmem [shape: f32[1,3072], index: 2, kind: input, shape index: {}]   ;;  %s5221_s3 = inlined_call_operand.hbm [shape: f32[2,3072], index: 3, kind: output, shape index: {}]  }
   0x1   :  { %v47_v0 = vld [vmem:[%s5219_s1 + $0xf8] sm:$0xff]  ;;  %v46_v4 = vld [vmem:[%s5219_s1 + $0xf0] sm:$0xff]  ;;  %v45_v8 = vld [vmem:[%s5219_s1 + $0xe8] sm:$0xff] }
   0x2   :  { %v79_v1 = vld [vmem:[%s5219_s1 + $0x1f8] sm:$0xff]  ;;  %3082 = vmatprep.subr.msk.mxu0 %vm526_vm0, %v47_v0  ;;  %v78_v5 = vld [vmem:[%s5219_s1 + $0x1f0] sm:$0xff]  ;;  %v77_v9 = vld [vmem:[%s5219_s1 + $0x1e8] sm:$0xff] }
   0x3   :  { %v31_v2 = vld [vmem:[%s5219_s1 + $0x78] sm:$0xff]  ;;  %3116 = vmatprep.subr.msk.mxu1 %vm526_vm0, %v79_v1  ;;  %v30_v6 = vld [vmem:[%s5219_s1 + $0x70] sm:$0xff]  ;;  %v29_v10 = vld [vmem:[%s5219_s1 + $0x68] sm:$0xff] }
   0x4   :  { %v63_v3 = vld [vmem:[%s5219_s1 + $0x178] sm:$0xff]  ;;  %3083 = vmatpush3.xpose.msk.msra.mxu0 %vm526_vm0, %v31_v2  ;;  %v62_v7 = vld [vmem:[%s5219_s1 + $0x170] sm:$0xff]  ;;  %v61_v11 = vld [vmem:[%s5219_s1 + $0x168] sm:$0xff] }
   0x5   :  { %3117 = vmatpush3.xpose.msk.msra.mxu1 %vm526_vm0, %v63_v3  ;;  %3084 = vmatprep.subr.msk.mxu0 %vm526_vm0, %v46_v4  ;;  %v44_v12 = vld [vmem:[%s5219_s1 + $0xe0] sm:$0xff]  ;;  %v43_v16 = vld [vmem:[%s5219_s1 + $0xd8] sm:$0xff]  ;;  %v42_v20 = vld [vmem:[%s5219_s1 + $0xd0] sm:$0xff] }
   0x6   :  { %3118 = vmatprep.subr.msk.mxu1 %vm526_vm0, %v78_v5  ;;  %v76_v13 = vld [vmem:[%s5219_s1 + $0x1e0] sm:$0xff]  ;;  %v75_v17 = vld [vmem:[%s5219_s1 + $0x1d8] sm:$0xff]  ;;  %v74_v21 = vld [vmem:[%s5219_s1 + $0x1d0] sm:$0xff] }
   0x7   :  { %v28_v14 = vld [vmem:[%s5219_s1 + $0x60] sm:$0xff]  ;;  %v27_v18 = vld [vmem:[%s5219_s1 + $0x58] sm:$0xff]  ;;  %v26_v22 = vld [vmem:[%s5219_s1 + $0x50] sm:$0xff] }
   0x8   :  { %3085 = vmatpush3.xpose.msk.msra.mxu0 %vm526_vm0, %v30_v6  ;;  %v60_v15 = vld [vmem:[%s5219_s1 + $0x160] sm:$0xff]  ;;  %v59_v19 = vld [vmem:[%s5219_s1 + $0x158] sm:$0xff]  ;;  %v58_v23 = vld [vmem:[%s5219_s1 + $0x150] sm:$0xff] }
   0x9   :  { %3119 = vmatpush3.xpose.msk.msra.mxu1 %vm526_vm0, %v62_v7  ;;  %3086 = vmatprep.subr.msk.mxu0 %vm526_vm0, %v45_v8  ;;  %v41_v24 = vld [vmem:[%s5219_s1 + $0xc8] sm:$0xff]  ;;  %v3640_v26 = vld [vmem:[%s5218_s0] sm:$0x3]  ;;  %v39_v33 = vld [vmem:[%s5219_s1 + $0xb8] sm:$0xff] }
   0xa   :  { %3120 = vmatprep.subr.msk.mxu1 %vm526_vm0, %v77_v9  ;;  %v73_v25 = vld [vmem:[%s5219_s1 + $0x1c8] sm:$0xff]  ;;  %v40_v29 = vld [vmem:[%s5219_s1 + $0xc0] sm:$0xff]  ;;  %3114 = vmatprep.mubr.msk.f32.mxu0 %vm526_vm0, %v3640_v26  ;;  %v71_v34 = vld [vmem:[%s5219_s1 + $0x1b8] sm:$0xff] }
   0xb   :  { %v25_v27 = vld [vmem:[%s5219_s1 + $0x48] sm:$0xff]  ;;  %v72_v30 = vld [vmem:[%s5219_s1 + $0x1c0] sm:$0xff]  ;;  %3148 = vmatprep.mubr.msk.f32.mxu1 %vm526_vm0, %v3640_v26  ;;  %v23_v35 = vld [vmem:[%s5219_s1 + $0x38] sm:$0xff] }
   0xc   :  { %3087 = vmatpush3.xpose.msk.msra.mxu0 %vm526_vm0, %v29_v10  ;;  %v57_v28 = vld [vmem:[%s5219_s1 + $0x148] sm:$0xff]  ;;  %v24_v31 = vld [vmem:[%s5219_s1 + $0x40] sm:$0xff]  ;;  %v55_v36 = vld [vmem:[%s5219_s1 + $0x138] sm:$0xff] }
   0xd   :  { %3121 = vmatpush3.xpose.msk.msra.mxu1 %vm526_vm0, %v61_v11  ;;  %3088 = vmatprep.subr.msk.mxu0 %vm526_vm0, %v44_v12  ;;  %v56_v32 = vld [vmem:[%s5219_s1 + $0x140] sm:$0xff]  ;;  %v38_v37 = vld [vmem:[%s5219_s1 + $0xb0] sm:$0xff]  ;;  %v37_v41 = vld [vmem:[%s5219_s1 + $0xa8] sm:$0xff] }
   0xe   :  { %3122 = vmatprep.subr.msk.mxu1 %vm526_vm0, %v76_v13  ;;  %v70_v38 = vld [vmem:[%s5219_s1 + $0x1b0] sm:$0xff]  ;;  %v69_v42 = vld [vmem:[%s5219_s1 + $0x1a8] sm:$0xff]  ;;  %v36_v45 = vld [vmem:[%s5219_s1 + $0xa0] sm:$0xff] }
   0xf   :  { %v22_v39 = vld [vmem:[%s5219_s1 + $0x30] sm:$0xff]  ;;  %v21_v43 = vld [vmem:[%s5219_s1 + $0x28] sm:$0xff]  ;;  %v68_v46 = vld [vmem:[%s5219_s1 + $0x1a0] sm:$0xff] }
  0x10   :  { %3089 = vmatpush3.xpose.msk.msra.mxu0 %vm526_vm0, %v28_v14  ;;  %v54_v40 = vld [vmem:[%s5219_s1 + $0x130] sm:$0xff]  ;;  %v53_v44 = vld [vmem:[%s5219_s1 + $0x128] sm:$0xff]  ;;  %v20_v47 = vld [vmem:[%s5219_s1 + $0x20] sm:$0xff] }
  0x11   :  { %3123 = vmatpush3.xpose.msk.msra.mxu1 %vm526_vm0, %v60_v15  ;;  %3090 = vmatprep.subr.msk.mxu0 %vm526_vm0, %v43_v16  ;;  %v52_v48 = vld [vmem:[%s5219_s1 + $0x120] sm:$0xff]  ;;  %v35_v49 = vld [vmem:[%s5219_s1 + $0x98] sm:$0xff]  ;;  %v34_v53 = vld [vmem:[%s5219_s1 + $0x90] sm:$0xff] }
  0x12   :  { %3124 = vmatprep.subr.msk.mxu1 %vm526_vm0, %v75_v17  ;;  %v67_v50 = vld [vmem:[%s5219_s1 + $0x198] sm:$0xff]  ;;  %v66_v54 = vld [vmem:[%s5219_s1 + $0x190] sm:$0xff]  ;;  %v33_v57 = vld [vmem:[%s5219_s1 + $0x88] sm:$0xff] }
  0x13   :  { %v19_v51 = vld [vmem:[%s5219_s1 + $0x18] sm:$0xff]  ;;  %v18_v55 = vld [vmem:[%s5219_s1 + $0x10] sm:$0xff]  ;;  %v65_v58 = vld [vmem:[%s5219_s1 + $0x188] sm:$0xff] }
  0x14   :  { %3091 = vmatpush3.xpose.msk.msra.mxu0 %vm526_vm0, %v27_v18  ;;  %v51_v52 = vld [vmem:[%s5219_s1 + $0x118] sm:$0xff]  ;;  %v50_v56 = vld [vmem:[%s5219_s1 + $0x110] sm:$0xff]  ;;  %v17_v59 = vld [vmem:[%s5219_s1 + $0x8] sm:$0xff] }
  0x15   :  { %3125 = vmatpush3.xpose.msk.msra.mxu1 %vm526_vm0, %v59_v19  ;;  %3092 = vmatprep.subr.msk.mxu0 %vm526_vm0, %v42_v20  ;;  %v49_v60 = vld [vmem:[%s5219_s1 + $0x108] sm:$0xff]  ;;  %v32_v61 = vld [vmem:[%s5219_s1 + $0x80] sm:$0xff]  ;;  %v111_v1 = vld [vmem:[%s5219_s1 + $0x2f8] sm:$0xff] }
  0x16   :  { %3126 = vmatprep.subr.msk.mxu1 %vm526_vm0, %v74_v21  ;;  %v64_v62 = vld [vmem:[%s5219_s1 + $0x180] sm:$0xff]  ;;  %v143_v2 = vld [vmem:[%s5219_s1 + $0x3f8] sm:$0xff]  ;;  %v110_v5 = vld [vmem:[%s5219_s1 + $0x2f0] sm:$0xff] }
  0x17   :  { %v16_v63 = vld [vmem:[%s5219_s1] sm:$0xff]  ;;  %v95_v3 = vld [vmem:[%s5219_s1 + $0x278] sm:$0xff]  ;;  %v142_v6 = vld [vmem:[%s5219_s1 + $0x3f0] sm:$0xff] }
  0x18   :  { %3093 = vmatpush3.xpose.msk.msra.mxu0 %vm526_vm0, %v26_v22  ;;  %v48_v0 = vld [vmem:[%s5219_s1 + $0x100] sm:$0xff]  ;;  %v127_v4 = vld [vmem:[%s5219_s1 + $0x378] sm:$0xff] }
  0x19   :  { %3127 = vmatpush3.xpose.msk.msra.mxu1 %vm526_vm0, %v58_v23  ;;  %3094 = vmatprep.subr.msk.mxu0 %vm526_vm0, %v41_v24 }
  0x1a   :  { %3128 = vmatprep.subr.msk.mxu1 %vm526_vm0, %v73_v25 }
  0x1c   :  { %3095 = vmatpush3.xpose.msk.msra.mxu0 %vm526_vm0, %v25_v27 }
  0x1d   :  { %3129 = vmatpush3.xpose.msk.msra.mxu1 %vm526_vm0, %v57_v28  ;;  %3096 = vmatprep.subr.msk.mxu0 %vm526_vm0, %v40_v29 }
  0x1e   :  { %3130 = vmatprep.subr.msk.mxu1 %vm526_vm0, %v72_v30 }
  0x20   :  { %3097 = vmatpush3.xpose.msk.msra.mxu0 %vm526_vm0, %v24_v31 }
  0x21   :  { %3131 = vmatpush3.xpose.msk.msra.mxu1 %vm526_vm0, %v56_v32  ;;  %3098 = vmatprep.subr.msk.mxu0 %vm526_vm0, %v39_v33 }
  0x22   :  { %3132 = vmatprep.subr.msk.mxu1 %vm526_vm0, %v71_v34 }
  0x24   :  { %3099 = vmatpush3.xpose.msk.msra.mxu0 %vm526_vm0, %v23_v35 }
  0x25   :  { %3133 = vmatpush3.xpose.msk.msra.mxu1 %vm526_vm0, %v55_v36  ;;  %3100 = vmatprep.subr.msk.mxu0 %vm526_vm0, %v38_v37 }
  0x26   :  { %3134 = vmatprep.subr.msk.mxu1 %vm526_vm0, %v70_v38 }
  0x28   :  { %3101 = vmatpush3.xpose.msk.msra.mxu0 %vm526_vm0, %v22_v39 }
  0x29   :  { %3135 = vmatpush3.xpose.msk.msra.mxu1 %vm526_vm0, %v54_v40  ;;  %3102 = vmatprep.subr.msk.mxu0 %vm526_vm0, %v37_v41 }
  0x2a   :  { %3136 = vmatprep.subr.msk.mxu1 %vm526_vm0, %v69_v42 }
  0x2c   :  { %3103 = vmatpush3.xpose.msk.msra.mxu0 %vm526_vm0, %v21_v43 }
  0x2d   :  { %3137 = vmatpush3.xpose.msk.msra.mxu1 %vm526_vm0, %v53_v44  ;;  %3104 = vmatprep.subr.msk.mxu0 %vm526_vm0, %v36_v45 }
  0x2e   :  { %3138 = vmatprep.subr.msk.mxu1 %vm526_vm0, %v68_v46 }
  0x30   :  { %3105 = vmatpush3.xpose.msk.msra.mxu0 %vm526_vm0, %v20_v47 }
  0x31   :  { %3139 = vmatpush3.xpose.msk.msra.mxu1 %vm526_vm0, %v52_v48  ;;  %3106 = vmatprep.subr.msk.mxu0 %vm526_vm0, %v35_v49 }
  0x32   :  { %3140 = vmatprep.subr.msk.mxu1 %vm526_vm0, %v67_v50 }
  0x34   :  { %3107 = vmatpush3.xpose.msk.msra.mxu0 %vm526_vm0, %v19_v51 }
  0x35   :  { %3141 = vmatpush3.xpose.msk.msra.mxu1 %vm526_vm0, %v51_v52  ;;  %3108 = vmatprep.subr.msk.mxu0 %vm526_vm0, %v34_v53 }
  0x36   :  { %3142 = vmatprep.subr.msk.mxu1 %vm526_vm0, %v66_v54 }
  0x38   :  { %3109 = vmatpush3.xpose.msk.msra.mxu0 %vm526_vm0, %v18_v55 }
  0x39   :  { %3143 = vmatpush3.xpose.msk.msra.mxu1 %vm526_vm0, %v50_v56  ;;  %3110 = vmatprep.subr.msk.mxu0 %vm526_vm0, %v33_v57 }
  0x3a   :  { %3144 = vmatprep.subr.msk.mxu1 %vm526_vm0, %v65_v58 }
  0x3c   :  { %3111 = vmatpush3.xpose.msk.msra.mxu0 %vm526_vm0, %v17_v59 }
  0x3d   :  { %3145 = vmatpush3.xpose.msk.msra.mxu1 %vm526_vm0, %v49_v60  ;;  %3112 = vmatprep.subr.msk.mxu0 %vm526_vm0, %v32_v61 }
  0x3e   :  { %3146 = vmatprep.subr.msk.mxu1 %vm526_vm0, %v64_v62 }
  0x40   :  { %3113 = vmatpush3.xpose.msk.msra.mxu0 %vm526_vm0, %v16_v63 }
  0x41   :  { %3147 = vmatpush3.xpose.msk.msra.mxu1 %vm526_vm0, %v48_v0  ;;  %3150 = vmatprep.subr.msk.mxu0 %vm526_vm0, %v111_v1 }
  0x42   :  { %3184 = vmatprep.subr.msk.mxu1 %vm526_vm0, %v143_v2 }
  0x43   :  { %3115 = vmatmul.mubr.msk.f32.vlgmr.msra.gmra.mxu0 %vm526_vm0, %v3640_v26 }
  0x44   :  { %3149 = vmatmul.mubr.msk.f32.vlgmr.msra.gmra.mxu1 %vm526_vm0, %v3640_v26 }
  0x45   :  { %8 = vsyncpa [#allocation3], 0  ;;  %3151 = vmatpush3.xpose.msk.msra.mxu0 %vm526_vm0, %v95_v3  ;;  %3185 = vmatpush3.xpose.msk.msra.mxu1 %vm526_vm0, %v127_v4  ;;  %v94_v7 = vld [vmem:[%s5219_s1 + $0x270] sm:$0xff]  ;;  %v109_v9 = vld [vmem:[%s5219_s1 + $0x2e8] sm:$0xff] }
  0x46   :  { %3152 = vmatprep.subr.msk.mxu0 %vm526_vm0, %v110_v5  ;;  %3186 = vmatprep.subr.msk.mxu1 %vm526_vm0, %v142_v6  ;;  %v126_v8 = vld [vmem:[%s5219_s1 + $0x370] sm:$0xff]  ;;  %v141_v10 = vld [vmem:[%s5219_s1 + $0x3e8] sm:$0xff]  ;;  %v108_v13 = vld [vmem:[%s5219_s1 + $0x2e0] sm:$0xff] }
  0x47   :  { %3182 = vmatprep.mubr.msk.f32.mxu0 %vm526_vm0, %v3640_v26  ;;  %3216 = vmatprep.mubr.msk.f32.mxu1 %vm526_vm0, %v3640_v26  ;;  %v93_v11 = vld [vmem:[%s5219_s1 + $0x268] sm:$0xff]  ;;  %v140_v14 = vld [vmem:[%s5219_s1 + $0x3e0] sm:$0xff]  ;;  %v107_v17 = vld [vmem:[%s5219_s1 + $0x2d8] sm:$0xff] }
  0x48   :  { %v125_v12 = vld [vmem:[%s5219_s1 + $0x368] sm:$0xff]  ;;  %v92_v15 = vld [vmem:[%s5219_s1 + $0x260] sm:$0xff]  ;;  %v139_v18 = vld [vmem:[%s5219_s1 + $0x3d8] sm:$0xff] }
  0x49   :  { %3153 = vmatpush3.xpose.msk.msra.mxu0 %vm526_vm0, %v94_v7  ;;  %3187 = vmatpush3.xpose.msk.msra.mxu1 %vm526_vm0, %v126_v8  ;;  %v124_v16 = vld [vmem:[%s5219_s1 + $0x360] sm:$0xff]  ;;  %v91_v19 = vld [vmem:[%s5219_s1 + $0x258] sm:$0xff]  ;;  %v106_v21 = vld [vmem:[%s5219_s1 + $0x2d0] sm:$0xff] }
  0x4a   :  { %3154 = vmatprep.subr.msk.mxu0 %vm526_vm0, %v109_v9  ;;  %3188 = vmatprep.subr.msk.mxu1 %vm526_vm0, %v141_v10  ;;  %v123_v20 = vld [vmem:[%s5219_s1 + $0x358] sm:$0xff]  ;;  %v138_v22 = vld [vmem:[%s5219_s1 + $0x3d0] sm:$0xff]  ;;  %v105_v25 = vld [vmem:[%s5219_s1 + $0x2c8] sm:$0xff] }
  0x4b   :  { %v90_v23 = vld [vmem:[%s5219_s1 + $0x250] sm:$0xff]  ;;  %v137_v27 = vld [vmem:[%s5219_s1 + $0x3c8] sm:$0xff]  ;;  %v104_v30 = vld [vmem:[%s5219_s1 + $0x2c0] sm:$0xff] }
  0x4c   :  { %v122_v24 = vld [vmem:[%s5219_s1 + $0x350] sm:$0xff]  ;;  %v89_v28 = vld [vmem:[%s5219_s1 + $0x248] sm:$0xff]  ;;  %v136_v31 = vld [vmem:[%s5219_s1 + $0x3c0] sm:$0xff] }
  0x4d   :  { %3155 = vmatpush3.xpose.msk.msra.mxu0 %vm526_vm0, %v93_v11  ;;  %3189 = vmatpush3.xpose.msk.msra.mxu1 %vm526_vm0, %v125_v12  ;;  %v121_v29 = vld [vmem:[%s5219_s1 + $0x348] sm:$0xff]  ;;  %v88_v32 = vld [vmem:[%s5219_s1 + $0x240] sm:$0xff]  ;;  %v103_v34 = vld [vmem:[%s5219_s1 + $0x2b8] sm:$0xff] }
  0x4e   :  { %3156 = vmatprep.subr.msk.mxu0 %vm526_vm0, %v108_v13  ;;  %3190 = vmatprep.subr.msk.mxu1 %vm526_vm0, %v140_v14  ;;  %v120_v33 = vld [vmem:[%s5219_s1 + $0x340] sm:$0xff]  ;;  %v135_v35 = vld [vmem:[%s5219_s1 + $0x3b8] sm:$0xff]  ;;  %v102_v38 = vld [vmem:[%s5219_s1 + $0x2b0] sm:$0xff] }
  0x4f   :  { %v87_v36 = vld [vmem:[%s5219_s1 + $0x238] sm:$0xff]  ;;  %v134_v39 = vld [vmem:[%s5219_s1 + $0x3b0] sm:$0xff]  ;;  %v101_v42 = vld [vmem:[%s5219_s1 + $0x2a8] sm:$0xff] }
  0x50   :  { %v119_v37 = vld [vmem:[%s5219_s1 + $0x338] sm:$0xff]  ;;  %v86_v40 = vld [vmem:[%s5219_s1 + $0x230] sm:$0xff]  ;;  %v133_v43 = vld [vmem:[%s5219_s1 + $0x3a8] sm:$0xff] }
  0x51   :  { %3157 = vmatpush3.xpose.msk.msra.mxu0 %vm526_vm0, %v92_v15  ;;  %3191 = vmatpush3.xpose.msk.msra.mxu1 %vm526_vm0, %v124_v16  ;;  %v118_v41 = vld [vmem:[%s5219_s1 + $0x330] sm:$0xff]  ;;  %v85_v44 = vld [vmem:[%s5219_s1 + $0x228] sm:$0xff]  ;;  %v100_v46 = vld [vmem:[%s5219_s1 + $0x2a0] sm:$0xff] }
  0x52   :  { %3158 = vmatprep.subr.msk.mxu0 %vm526_vm0, %v107_v17  ;;  %3192 = vmatprep.subr.msk.mxu1 %vm526_vm0, %v139_v18  ;;  %v117_v45 = vld [vmem:[%s5219_s1 + $0x328] sm:$0xff]  ;;  %v132_v47 = vld [vmem:[%s5219_s1 + $0x3a0] sm:$0xff]  ;;  %v99_v50 = vld [vmem:[%s5219_s1 + $0x298] sm:$0xff] }
  0x53   :  { %v84_v48 = vld [vmem:[%s5219_s1 + $0x220] sm:$0xff]  ;;  %v131_v51 = vld [vmem:[%s5219_s1 + $0x398] sm:$0xff]  ;;  %v98_v54 = vld [vmem:[%s5219_s1 + $0x290] sm:$0xff] }
  0x54   :  { %v116_v49 = vld [vmem:[%s5219_s1 + $0x320] sm:$0xff]  ;;  %v83_v52 = vld [vmem:[%s5219_s1 + $0x218] sm:$0xff]  ;;  %v130_v55 = vld [vmem:[%s5219_s1 + $0x390] sm:$0xff] }
  0x55   :  { %3159 = vmatpush3.xpose.msk.msra.mxu0 %vm526_vm0, %v91_v19  ;;  %3193 = vmatpush3.xpose.msk.msra.mxu1 %vm526_vm0, %v123_v20  ;;  %v115_v53 = vld [vmem:[%s5219_s1 + $0x318] sm:$0xff]  ;;  %v82_v56 = vld [vmem:[%s5219_s1 + $0x210] sm:$0xff]  ;;  %v97_v58 = vld [vmem:[%s5219_s1 + $0x288] sm:$0xff] }
  0x56   :  { %3160 = vmatprep.subr.msk.mxu0 %vm526_vm0, %v106_v21  ;;  %3194 = vmatprep.subr.msk.mxu1 %vm526_vm0, %v138_v22  ;;  %v114_v57 = vld [vmem:[%s5219_s1 + $0x310] sm:$0xff]  ;;  %v129_v59 = vld [vmem:[%s5219_s1 + $0x388] sm:$0xff]  ;;  %v96_v62 = vld [vmem:[%s5219_s1 + $0x280] sm:$0xff] }
  0x57   :  { %v81_v60 = vld [vmem:[%s5219_s1 + $0x208] sm:$0xff]  ;;  %v128_v63 = vld [vmem:[%s5219_s1 + $0x380] sm:$0xff]  ;;  %v175_v2 = vld [vmem:[%s5219_s1 + $0x4f8] sm:$0xff] }
  0x58   :  { %v113_v61 = vld [vmem:[%s5219_s1 + $0x308] sm:$0xff]  ;;  %v80_v0 = vld [vmem:[%s5219_s1 + $0x200] sm:$0xff]  ;;  %v207_v3 = vld [vmem:[%s5219_s1 + $0x5f8] sm:$0xff] }
  0x59   :  { %3161 = vmatpush3.xpose.msk.msra.mxu0 %vm526_vm0, %v90_v23  ;;  %3195 = vmatpush3.xpose.msk.msra.mxu1 %vm526_vm0, %v122_v24  ;;  %v112_v1 = vld [vmem:[%s5219_s1 + $0x300] sm:$0xff]  ;;  %v159_v4 = vld [vmem:[%s5219_s1 + $0x478] sm:$0xff]  ;;  %v174_v6 = vld [vmem:[%s5219_s1 + $0x4f0] sm:$0xff] }
  0x5a   :  { %3162 = vmatprep.subr.msk.mxu0 %vm526_vm0, %v105_v25  ;;  %3196 = vmatprep.subr.msk.mxu1 %vm526_vm0, %v137_v27  ;;  %v191_v5 = vld [vmem:[%s5219_s1 + $0x578] sm:$0xff]  ;;  %v206_v7 = vld [vmem:[%s5219_s1 + $0x5f0] sm:$0xff]  ;;  %v173_v10 = vld [vmem:[%s5219_s1 + $0x4e8] sm:$0xff] }
  0x5b   :  { %v158_v8 = vld [vmem:[%s5219_s1 + $0x470] sm:$0xff]  ;;  %v205_v11 = vld [vmem:[%s5219_s1 + $0x5e8] sm:$0xff]  ;;  %v172_v14 = vld [vmem:[%s5219_s1 + $0x4e0] sm:$0xff] }
  0x5c   :  { %v190_v9 = vld [vmem:[%s5219_s1 + $0x570] sm:$0xff]  ;;  %v157_v12 = vld [vmem:[%s5219_s1 + $0x468] sm:$0xff]  ;;  %v204_v15 = vld [vmem:[%s5219_s1 + $0x5e0] sm:$0xff] }
  0x5d   :  { %3163 = vmatpush3.xpose.msk.msra.mxu0 %vm526_vm0, %v89_v28  ;;  %3197 = vmatpush3.xpose.msk.msra.mxu1 %vm526_vm0, %v121_v29  ;;  %v189_v13 = vld [vmem:[%s5219_s1 + $0x568] sm:$0xff]  ;;  %v156_v16 = vld [vmem:[%s5219_s1 + $0x460] sm:$0xff]  ;;  %v171_v18 = vld [vmem:[%s5219_s1 + $0x4d8] sm:$0xff] }
  0x5e   :  { %3164 = vmatprep.subr.msk.mxu0 %vm526_vm0, %v104_v30  ;;  %3198 = vmatprep.subr.msk.mxu1 %vm526_vm0, %v136_v31  ;;  %v188_v17 = vld [vmem:[%s5219_s1 + $0x560] sm:$0xff]  ;;  %v203_v19 = vld [vmem:[%s5219_s1 + $0x5d8] sm:$0xff]  ;;  %v170_v22 = vld [vmem:[%s5219_s1 + $0x4d0] sm:$0xff] }
  0x5f   :  { %v155_v20 = vld [vmem:[%s5219_s1 + $0x458] sm:$0xff]  ;;  %v202_v23 = vld [vmem:[%s5219_s1 + $0x5d0] sm:$0xff]  ;;  %v169_v27 = vld [vmem:[%s5219_s1 + $0x4c8] sm:$0xff] }
  0x60   :  { %v187_v21 = vld [vmem:[%s5219_s1 + $0x558] sm:$0xff]  ;;  %v154_v24 = vld [vmem:[%s5219_s1 + $0x450] sm:$0xff]  ;;  %v201_v28 = vld [vmem:[%s5219_s1 + $0x5c8] sm:$0xff] }
  0x61   :  { %3165 = vmatpush3.xpose.msk.msra.mxu0 %vm526_vm0, %v88_v32  ;;  %3199 = vmatpush3.xpose.msk.msra.mxu1 %vm526_vm0, %v120_v33  ;;  %v186_v25 = vld [vmem:[%s5219_s1 + $0x550] sm:$0xff]  ;;  %v153_v29 = vld [vmem:[%s5219_s1 + $0x448] sm:$0xff]  ;;  %v168_v31 = vld [vmem:[%s5219_s1 + $0x4c0] sm:$0xff] }
  0x62   :  { %3166 = vmatprep.subr.msk.mxu0 %vm526_vm0, %v103_v34  ;;  %3200 = vmatprep.subr.msk.mxu1 %vm526_vm0, %v135_v35  ;;  %v185_v30 = vld [vmem:[%s5219_s1 + $0x548] sm:$0xff]  ;;  %v200_v32 = vld [vmem:[%s5219_s1 + $0x5c0] sm:$0xff]  ;;  %v167_v35 = vld [vmem:[%s5219_s1 + $0x4b8] sm:$0xff] }
  0x63   :  { %v152_v33 = vld [vmem:[%s5219_s1 + $0x440] sm:$0xff] }
  0x64   :  { %v184_v34 = vld [vmem:[%s5219_s1 + $0x540] sm:$0xff] }
  0x65   :  { %3167 = vmatpush3.xpose.msk.msra.mxu0 %vm526_vm0, %v87_v36  ;;  %3201 = vmatpush3.xpose.msk.msra.mxu1 %vm526_vm0, %v119_v37  ;;  %v199_v36 = vld [vmem:[%s5219_s1 + $0x5b8] sm:$0xff] }
  0x66   :  { %3168 = vmatprep.subr.msk.mxu0 %vm526_vm0, %v102_v38  ;;  %3202 = vmatprep.subr.msk.mxu1 %vm526_vm0, %v134_v39  ;;  %v151_v37 = vld [vmem:[%s5219_s1 + $0x438] sm:$0xff]  ;;  %v166_v39 = vld [vmem:[%s5219_s1 + $0x4b0] sm:$0xff] }
  0x67   :  { %v183_v38 = vld [vmem:[%s5219_s1 + $0x538] sm:$0xff] }
  0x69   :  { %3169 = vmatpush3.xpose.msk.msra.mxu0 %vm526_vm0, %v86_v40  ;;  %3203 = vmatpush3.xpose.msk.msra.mxu1 %vm526_vm0, %v118_v41  ;;  %v198_v40 = vld [vmem:[%s5219_s1 + $0x5b0] sm:$0xff] }
  0x6a   :  { %3170 = vmatprep.subr.msk.mxu0 %vm526_vm0, %v101_v42  ;;  %3204 = vmatprep.subr.msk.mxu1 %vm526_vm0, %v133_v43  ;;  %v150_v41 = vld [vmem:[%s5219_s1 + $0x430] sm:$0xff]  ;;  %v165_v43 = vld [vmem:[%s5219_s1 + $0x4a8] sm:$0xff] }
  0x6b   :  { %v182_v42 = vld [vmem:[%s5219_s1 + $0x530] sm:$0xff] }
  0x6d   :  { %3171 = vmatpush3.xpose.msk.msra.mxu0 %vm526_vm0, %v85_v44  ;;  %3205 = vmatpush3.xpose.msk.msra.mxu1 %vm526_vm0, %v117_v45  ;;  %v197_v44 = vld [vmem:[%s5219_s1 + $0x5a8] sm:$0xff] }
  0x6e   :  { %3172 = vmatprep.subr.msk.mxu0 %vm526_vm0, %v100_v46  ;;  %3206 = vmatprep.subr.msk.mxu1 %vm526_vm0, %v132_v47  ;;  %v149_v45 = vld [vmem:[%s5219_s1 + $0x428] sm:$0xff]  ;;  %v164_v47 = vld [vmem:[%s5219_s1 + $0x4a0] sm:$0xff] }
  0x6f   :  { %v181_v46 = vld [vmem:[%s5219_s1 + $0x528] sm:$0xff] }
  0x71   :  { %3173 = vmatpush3.xpose.msk.msra.mxu0 %vm526_vm0, %v84_v48  ;;  %3207 = vmatpush3.xpose.msk.msra.mxu1 %vm526_vm0, %v116_v49  ;;  %v196_v48 = vld [vmem:[%s5219_s1 + $0x5a0] sm:$0xff] }
  0x72   :  { %3174 = vmatprep.subr.msk.mxu0 %vm526_vm0, %v99_v50  ;;  %3208 = vmatprep.subr.msk.mxu1 %vm526_vm0, %v131_v51  ;;  %v148_v49 = vld [vmem:[%s5219_s1 + $0x420] sm:$0xff]  ;;  %v163_v51 = vld [vmem:[%s5219_s1 + $0x498] sm:$0xff] }
  0x73   :  { %v180_v50 = vld [vmem:[%s5219_s1 + $0x520] sm:$0xff] }
  0x75   :  { %3175 = vmatpush3.xpose.msk.msra.mxu0 %vm526_vm0, %v83_v52  ;;  %3209 = vmatpush3.xpose.msk.msra.mxu1 %vm526_vm0, %v115_v53  ;;  %v195_v52 = vld [vmem:[%s5219_s1 + $0x598] sm:$0xff] }
  0x76   :  { %3176 = vmatprep.subr.msk.mxu0 %vm526_vm0, %v98_v54  ;;  %3210 = vmatprep.subr.msk.mxu1 %vm526_vm0, %v130_v55  ;;  %v147_v53 = vld [vmem:[%s5219_s1 + $0x418] sm:$0xff]  ;;  %v162_v55 = vld [vmem:[%s5219_s1 + $0x490] sm:$0xff] }
  0x77   :  { %v179_v54 = vld [vmem:[%s5219_s1 + $0x518] sm:$0xff] }
  0x79   :  { %3177 = vmatpush3.xpose.msk.msra.mxu0 %vm526_vm0, %v82_v56  ;;  %3211 = vmatpush3.xpose.msk.msra.mxu1 %vm526_vm0, %v114_v57  ;;  %v194_v56 = vld [vmem:[%s5219_s1 + $0x590] sm:$0xff] }
  0x7a   :  { %3178 = vmatprep.subr.msk.mxu0 %vm526_vm0, %v97_v58  ;;  %3212 = vmatprep.subr.msk.mxu1 %vm526_vm0, %v129_v59  ;;  %v146_v57 = vld [vmem:[%s5219_s1 + $0x410] sm:$0xff]  ;;  %v161_v59 = vld [vmem:[%s5219_s1 + $0x488] sm:$0xff] }
  0x7b   :  { %v178_v58 = vld [vmem:[%s5219_s1 + $0x510] sm:$0xff] }
  0x7d   :  { %3179 = vmatpush3.xpose.msk.msra.mxu0 %vm526_vm0, %v81_v60  ;;  %3213 = vmatpush3.xpose.msk.msra.mxu1 %vm526_vm0, %v113_v61  ;;  %v193_v60 = vld [vmem:[%s5219_s1 + $0x588] sm:$0xff] }
  0x7e   :  { %3180 = vmatprep.subr.msk.mxu0 %vm526_vm0, %v96_v62  ;;  %3214 = vmatprep.subr.msk.mxu1 %vm526_vm0, %v128_v63  ;;  %v145_v61 = vld [vmem:[%s5219_s1 + $0x408] sm:$0xff]  ;;  %v160_v63 = vld [vmem:[%s5219_s1 + $0x480] sm:$0xff] }
  0x7f   :  { %v177_v62 = vld [vmem:[%s5219_s1 + $0x508] sm:$0xff] }
  0x81   :  { %3181 = vmatpush3.xpose.msk.msra.mxu0 %vm526_vm0, %v80_v0  ;;  %3215 = vmatpush3.xpose.msk.msra.mxu1 %vm526_vm0, %v112_v1  ;;  %v192_v0 = vld [vmem:[%s5219_s1 + $0x580] sm:$0xff] }
  0x82   :  { %3218 = vmatprep.subr.msk.mxu0 %vm526_vm0, %v175_v2  ;;  %3252 = vmatprep.subr.msk.mxu1 %vm526_vm0, %v207_v3  ;;  %v144_v1 = vld [vmem:[%s5219_s1 + $0x400] sm:$0xff]  ;;  %v239_v3 = vld [vmem:[%s5219_s1 + $0x6f8] sm:$0xff] }
  0x83   :  { %v176_v2 = vld [vmem:[%s5219_s1 + $0x500] sm:$0xff] }
  0x84   :  { %3183 = vmatmul.mubr.msk.f32.vlgmr.msra.gmra.mxu0 %vm526_vm0, %v3640_v26  ;;  %3217 = vmatmul.mubr.msk.f32.vlgmr.msra.gmra.mxu1 %vm526_vm0, %v3640_v26 }
  0x85   :  { %3219 = vmatpush3.xpose.msk.msra.mxu0 %vm526_vm0, %v159_v4  ;;  %3253 = vmatpush3.xpose.msk.msra.mxu1 %vm526_vm0, %v191_v5  ;;  %v271_v4 = vld [vmem:[%s5219_s1 + $0x7f8] sm:$0xff] }
  0x86   :  { %3220 = vmatprep.subr.msk.mxu0 %vm526_vm0, %v174_v6  ;;  %3254 = vmatprep.subr.msk.mxu1 %vm526_vm0, %v206_v7  ;;  %v223_v5 = vld [vmem:[%s5219_s1 + $0x678] sm:$0xff]  ;;  %v238_v7 = vld [vmem:[%s5219_s1 + $0x6f0] sm:$0xff] }
  0x87   :  { %3250 = vmatprep.mubr.msk.f32.mxu0 %vm526_vm0, %v3640_v26  ;;  %3284 = vmatprep.mubr.msk.f32.mxu1 %vm526_vm0, %v3640_v26  ;;  %v255_v6 = vld [vmem:[%s5219_s1 + $0x778] sm:$0xff] }
  0x89   :  { %3221 = vmatpush3.xpose.msk.msra.mxu0 %vm526_vm0, %v158_v8  ;;  %3255 = vmatpush3.xpose.msk.msra.mxu1 %vm526_vm0, %v190_v9  ;;  %v270_v8 = vld [vmem:[%s5219_s1 + $0x7f0] sm:$0xff] }
  0x8a   :  { %3222 = vmatprep.subr.msk.mxu0 %vm526_vm0, %v173_v10  ;;  %3256 = vmatprep.subr.msk.mxu1 %vm526_vm0, %v205_v11  ;;  %v222_v9 = vld [vmem:[%s5219_s1 + $0x670] sm:$0xff]  ;;  %v237_v11 = vld [vmem:[%s5219_s1 + $0x6e8] sm:$0xff] }
  0x8b   :  { %v254_v10 = vld [vmem:[%s5219_s1 + $0x770] sm:$0xff] }
  0x8d   :  { %3223 = vmatpush3.xpose.msk.msra.mxu0 %vm526_vm0, %v157_v12  ;;  %3257 = vmatpush3.xpose.msk.msra.mxu1 %vm526_vm0, %v189_v13  ;;  %v269_v12 = vld [vmem:[%s5219_s1 + $0x7e8] sm:$0xff] }
  0x8e   :  { %3224 = vmatprep.subr.msk.mxu0 %vm526_vm0, %v172_v14  ;;  %3258 = vmatprep.subr.msk.mxu1 %vm526_vm0, %v204_v15  ;;  %v221_v13 = vld [vmem:[%s5219_s1 + $0x668] sm:$0xff]  ;;  %v236_v15 = vld [vmem:[%s5219_s1 + $0x6e0] sm:$0xff] }
  0x8f   :  { %v253_v14 = vld [vmem:[%s5219_s1 + $0x768] sm:$0xff] }
  0x91   :  { %3225 = vmatpush3.xpose.msk.msra.mxu0 %vm526_vm0, %v156_v16  ;;  %3259 = vmatpush3.xpose.msk.msra.mxu1 %vm526_vm0, %v188_v17  ;;  %v268_v16 = vld [vmem:[%s5219_s1 + $0x7e0] sm:$0xff] }
  0x92   :  { %3226 = vmatprep.subr.msk.mxu0 %vm526_vm0, %v171_v18  ;;  %3260 = vmatprep.subr.msk.mxu1 %vm526_vm0, %v203_v19  ;;  %v220_v17 = vld [vmem:[%s5219_s1 + $0x660] sm:$0xff]  ;;  %v235_v19 = vld [vmem:[%s5219_s1 + $0x6d8] sm:$0xff] }
  0x93   :  { %v252_v18 = vld [vmem:[%s5219_s1 + $0x760] sm:$0xff] }
  0x95   :  { %3227 = vmatpush3.xpose.msk.msra.mxu0 %vm526_vm0, %v155_v20  ;;  %3261 = vmatpush3.xpose.msk.msra.mxu1 %vm526_vm0, %v187_v21  ;;  %v267_v20 = vld [vmem:[%s5219_s1 + $0x7d8] sm:$0xff] }
  0x96   :  { %3228 = vmatprep.subr.msk.mxu0 %vm526_vm0, %v170_v22  ;;  %3262 = vmatprep.subr.msk.mxu1 %vm526_vm0, %v202_v23  ;;  %v219_v21 = vld [vmem:[%s5219_s1 + $0x658] sm:$0xff]  ;;  %v234_v23 = vld [vmem:[%s5219_s1 + $0x6d0] sm:$0xff] }
  0x97   :  { %v251_v22 = vld [vmem:[%s5219_s1 + $0x758] sm:$0xff] }
  0x99   :  { %3229 = vmatpush3.xpose.msk.msra.mxu0 %vm526_vm0, %v154_v24  ;;  %3263 = vmatpush3.xpose.msk.msra.mxu1 %vm526_vm0, %v186_v25  ;;  %v266_v24 = vld [vmem:[%s5219_s1 + $0x7d0] sm:$0xff] }
  0x9a   :  { %3230 = vmatprep.subr.msk.mxu0 %vm526_vm0, %v169_v27  ;;  %3264 = vmatprep.subr.msk.mxu1 %vm526_vm0, %v201_v28  ;;  %v218_v25 = vld [vmem:[%s5219_s1 + $0x650] sm:$0xff]  ;;  %v233_v28 = vld [vmem:[%s5219_s1 + $0x6c8] sm:$0xff] }
  0x9b   :  { %v250_v27 = vld [vmem:[%s5219_s1 + $0x750] sm:$0xff] }
  0x9d   :  { %3231 = vmatpush3.xpose.msk.msra.mxu0 %vm526_vm0, %v153_v29  ;;  %3265 = vmatpush3.xpose.msk.msra.mxu1 %vm526_vm0, %v185_v30  ;;  %v265_v29 = vld [vmem:[%s5219_s1 + $0x7c8] sm:$0xff] }
  0x9e   :  { %3232 = vmatprep.subr.msk.mxu0 %vm526_vm0, %v168_v31  ;;  %3266 = vmatprep.subr.msk.mxu1 %vm526_vm0, %v200_v32  ;;  %v217_v30 = vld [vmem:[%s5219_s1 + $0x648] sm:$0xff]  ;;  %v232_v32 = vld [vmem:[%s5219_s1 + $0x6c0] sm:$0xff] }
  0x9f   :  { %v249_v31 = vld [vmem:[%s5219_s1 + $0x748] sm:$0xff] }
  0xa1   :  { %3233 = vmatpush3.xpose.msk.msra.mxu0 %vm526_vm0, %v152_v33  ;;  %3267 = vmatpush3.xpose.msk.msra.mxu1 %vm526_vm0, %v184_v34  ;;  %v264_v33 = vld [vmem:[%s5219_s1 + $0x7c0] sm:$0xff] }
  0xa2   :  { %3234 = vmatprep.subr.msk.mxu0 %vm526_vm0, %v167_v35  ;;  %3268 = vmatprep.subr.msk.mxu1 %vm526_vm0, %v199_v36  ;;  %v216_v34 = vld [vmem:[%s5219_s1 + $0x640] sm:$0xff]  ;;  %v231_v36 = vld [vmem:[%s5219_s1 + $0x6b8] sm:$0xff] }
  0xa3   :  { %v248_v35 = vld [vmem:[%s5219_s1 + $0x740] sm:$0xff] }
  0xa5   :  { %3235 = vmatpush3.xpose.msk.msra.mxu0 %vm526_vm0, %v151_v37  ;;  %3269 = vmatpush3.xpose.msk.msra.mxu1 %vm526_vm0, %v183_v38  ;;  %v263_v37 = vld [vmem:[%s5219_s1 + $0x7b8] sm:$0xff] }
  0xa6   :  { %3236 = vmatprep.subr.msk.mxu0 %vm526_vm0, %v166_v39  ;;  %3270 = vmatprep.subr.msk.mxu1 %vm526_vm0, %v198_v40  ;;  %v215_v38 = vld [vmem:[%s5219_s1 + $0x638] sm:$0xff]  ;;  %v230_v40 = vld [vmem:[%s5219_s1 + $0x6b0] sm:$0xff] }
  0xa7   :  { %v247_v39 = vld [vmem:[%s5219_s1 + $0x738] sm:$0xff] }
  0xa9   :  { %3237 = vmatpush3.xpose.msk.msra.mxu0 %vm526_vm0, %v150_v41  ;;  %3271 = vmatpush3.xpose.msk.msra.mxu1 %vm526_vm0, %v182_v42  ;;  %v262_v41 = vld [vmem:[%s5219_s1 + $0x7b0] sm:$0xff] }
  0xaa   :  { %3238 = vmatprep.subr.msk.mxu0 %vm526_vm0, %v165_v43  ;;  %3272 = vmatprep.subr.msk.mxu1 %vm526_vm0, %v197_v44  ;;  %v214_v42 = vld [vmem:[%s5219_s1 + $0x630] sm:$0xff]  ;;  %v229_v44 = vld [vmem:[%s5219_s1 + $0x6a8] sm:$0xff] }
  0xab   :  { %v246_v43 = vld [vmem:[%s5219_s1 + $0x730] sm:$0xff] }
  0xad   :  { %3239 = vmatpush3.xpose.msk.msra.mxu0 %vm526_vm0, %v149_v45  ;;  %3273 = vmatpush3.xpose.msk.msra.mxu1 %vm526_vm0, %v181_v46  ;;  %v261_v45 = vld [vmem:[%s5219_s1 + $0x7a8] sm:$0xff] }
  0xae   :  { %3240 = vmatprep.subr.msk.mxu0 %vm526_vm0, %v164_v47  ;;  %3274 = vmatprep.subr.msk.mxu1 %vm526_vm0, %v196_v48  ;;  %v213_v46 = vld [vmem:[%s5219_s1 + $0x628] sm:$0xff]  ;;  %v228_v48 = vld [vmem:[%s5219_s1 + $0x6a0] sm:$0xff] }
  0xaf   :  { %v245_v47 = vld [vmem:[%s5219_s1 + $0x728] sm:$0xff] }
  0xb1   :  { %3241 = vmatpush3.xpose.msk.msra.mxu0 %vm526_vm0, %v148_v49  ;;  %3275 = vmatpush3.xpose.msk.msra.mxu1 %vm526_vm0, %v180_v50  ;;  %v260_v49 = vld [vmem:[%s5219_s1 + $0x7a0] sm:$0xff] }
  0xb2   :  { %3242 = vmatprep.subr.msk.mxu0 %vm526_vm0, %v163_v51  ;;  %3276 = vmatprep.subr.msk.mxu1 %vm526_vm0, %v195_v52  ;;  %v212_v50 = vld [vmem:[%s5219_s1 + $0x620] sm:$0xff]  ;;  %v227_v52 = vld [vmem:[%s5219_s1 + $0x698] sm:$0xff] }
  0xb3   :  { %v244_v51 = vld [vmem:[%s5219_s1 + $0x720] sm:$0xff] }
  0xb5   :  { %3243 = vmatpush3.xpose.msk.msra.mxu0 %vm526_vm0, %v147_v53  ;;  %3277 = vmatpush3.xpose.msk.msra.mxu1 %vm526_vm0, %v179_v54  ;;  %v259_v53 = vld [vmem:[%s5219_s1 + $0x798] sm:$0xff] }
  0xb6   :  { %3244 = vmatprep.subr.msk.mxu0 %vm526_vm0, %v162_v55  ;;  %3278 = vmatprep.subr.msk.mxu1 %vm526_vm0, %v194_v56  ;;  %v211_v54 = vld [vmem:[%s5219_s1 + $0x618] sm:$0xff]  ;;  %v226_v56 = vld [vmem:[%s5219_s1 + $0x690] sm:$0xff] }
  0xb7   :  { %v243_v55 = vld [vmem:[%s5219_s1 + $0x718] sm:$0xff] }
  0xb9   :  { %3245 = vmatpush3.xpose.msk.msra.mxu0 %vm526_vm0, %v146_v57  ;;  %3279 = vmatpush3.xpose.msk.msra.mxu1 %vm526_vm0, %v178_v58  ;;  %v258_v57 = vld [vmem:[%s5219_s1 + $0x790] sm:$0xff]  ;;  %v406_v58 = vlaneseq }
  0xba   :  { %3246 = vmatprep.subr.msk.mxu0 %vm526_vm0, %v161_v59  ;;  %3280 = vmatprep.subr.msk.mxu1 %vm526_vm0, %v193_v60  ;;  %v210_v59 = vld [vmem:[%s5219_s1 + $0x610] sm:$0xff] }
  0xbb   :  { %v242_v60 = vld [vmem:[%s5219_s1 + $0x710] sm:$0xff] }
  0xbd   :  { %3247 = vmatpush3.xpose.msk.msra.mxu0 %vm526_vm0, %v145_v61  ;;  %3281 = vmatpush3.xpose.msk.msra.mxu1 %vm526_vm0, %v177_v62  ;;  %v225_v61 = vld [vmem:[%s5219_s1 + $0x688] sm:$0xff] }
  0xbe   :  { %3248 = vmatprep.subr.msk.mxu0 %vm526_vm0, %v160_v63  ;;  %3282 = vmatprep.subr.msk.mxu1 %vm526_vm0, %v192_v0  ;;  %v257_v62 = vld [vmem:[%s5219_s1 + $0x788] sm:$0xff]  ;;  %v4568_v63 = vshrl.u32 %v406_v58, 7 }
  0xbf   :  { %v209_v0 = vld [vmem:[%s5219_s1 + $0x608] sm:$0xff] }
  0xc0   :  { %v329_v58 = vld [vmem:[%s5219_s1 + $0x9c8] sm:$0xff] }
  0xc1   :  { %3249 = vmatpush3.xpose.msk.msra.mxu0 %vm526_vm0, %v144_v1  ;;  %3283 = vmatpush3.xpose.msk.msra.mxu1 %vm526_vm0, %v176_v2  ;;  %v241_v1 = vld [vmem:[%s5219_s1 + $0x708] sm:$0xff]  ;;  %v224_v2 = vld [vmem:[%s5219_s1 + $0x680] sm:$0xff] }
  0xc2   :  { %3286 = vmatprep.subr.msk.mxu0 %vm526_vm0, %v239_v3  ;;  %3320 = vmatprep.subr.msk.mxu1 %vm526_vm0, %v271_v4  ;;  %v256_v3 = vld [vmem:[%s5219_s1 + $0x780] sm:$0xff]  ;;  %v4587_v4 = vsub.s32 0, %v4568_v63 }
  0xc4   :  { %3251 = vmatmul.mubr.msk.f32.vlgmr.msra.gmra.mxu0 %vm526_vm0, %v3640_v26  ;;  %3285 = vmatmul.mubr.msk.f32.vlgmr.msra.gmra.mxu1 %vm526_vm0, %v3640_v26 }
  0xc5   :  { %3287 = vmatpush3.xpose.msk.msra.mxu0 %vm526_vm0, %v223_v5  ;;  %3321 = vmatpush3.xpose.msk.msra.mxu1 %vm526_vm0, %v255_v6  ;;  %v4590_v5 = vsub.s32 2, %v4568_v63  ;;  %v208_v6 = vld [vmem:[%s5219_s1 + $0x600] sm:$0xff] }
  0xc6   :  { %3288 = vmatprep.subr.msk.mxu0 %vm526_vm0, %v238_v7  ;;  %3322 = vmatprep.subr.msk.mxu1 %vm526_vm0, %v270_v8  ;;  %v240_v7 = vld [vmem:[%s5219_s1 + $0x700] sm:$0xff] }
  0xc7   :  { %3318 = vmatprep.mubr.msk.f32.mxu0 %vm526_vm0, %v3640_v26  ;;  %3352 = vmatprep.mubr.msk.f32.mxu1 %vm526_vm0, %v3640_v26  ;;  %v4603_v8 = vld [vmem:[%s5220_s2] sm:$0xff] }
  0xc9   :  { %3289 = vmatpush3.xpose.msk.msra.mxu0 %vm526_vm0, %v222_v9  ;;  %3323 = vmatpush3.xpose.msk.msra.mxu1 %vm526_vm0, %v254_v10  ;;  %v303_v9 = vld [vmem:[%s5219_s1 + $0x8f8] sm:$0xff] }
  0xca   :  { %3290 = vmatprep.subr.msk.mxu0 %vm526_vm0, %v237_v11  ;;  %3324 = vmatprep.subr.msk.mxu1 %vm526_vm0, %v269_v12  ;;  %v335_v10 = vld [vmem:[%s5219_s1 + $0x9f8] sm:$0xff]  ;;  %v4612_v11 = vsub.s32 1, %v4568_v63  ;;  %v3515_v12 = vmov 1983009808  }
  0xcd   :  { %3291 = vmatpush3.xpose.msk.msra.mxu0 %vm526_vm0, %v221_v13  ;;  %3325 = vmatpush3.xpose.msk.msra.mxu1 %vm526_vm0, %v253_v14  ;;  %v2561_v13 = vunpack.c.l.s4 %v3515_v12  ;;  %v4615_v14 = vsub.s32 3, %v4568_v63  ;;  %v278_v12 = vld [vmem:[%s5219_s1 + $0x830] sm:$0xff] }
  0xce   :  { %3292 = vmatprep.subr.msk.mxu0 %vm526_vm0, %v236_v15  ;;  %3326 = vmatprep.subr.msk.mxu1 %vm526_vm0, %v268_v16  ;;  %v409_v15 = vrot.slane %v4603_v8, %v4587_v4  ;;  %v417_v16 = vrot.slane %v4603_v8, %v4590_v5 }
  0xd1   :  { %3293 = vmatpush3.xpose.msk.msra.mxu0 %vm526_vm0, %v220_v17  ;;  %3327 = vmatpush3.xpose.msk.msra.mxu1 %vm526_vm0, %v252_v18  ;;  %v287_v17 = vld [vmem:[%s5219_s1 + $0x878] sm:$0xff] }
  0xd2   :  { %3294 = vmatprep.subr.msk.mxu0 %vm526_vm0, %v235_v19  ;;  %3328 = vmatprep.subr.msk.mxu1 %vm526_vm0, %v267_v20  ;;  %v319_v18 = vld [vmem:[%s5219_s1 + $0x978] sm:$0xff]  ;;  %v413_v19 = vrot.slane %v4603_v8, %v4612_v11  ;;  %v2562_v20 = vunpack.c.0.s8 %v2561_v13  ;;  %v310_v13 = vld [vmem:[%s5219_s1 + $0x930] sm:$0xff] }
  0xd5   :  { %3295 = vmatpush3.xpose.msk.msra.mxu0 %vm526_vm0, %v219_v21  ;;  %3329 = vmatpush3.xpose.msk.msra.mxu1 %vm526_vm0, %v251_v22  ;;  %v421_v21 = vrot.slane %v4603_v8, %v4615_v14  ;;  %v302_v22 = vld [vmem:[%s5219_s1 + $0x8f0] sm:$0xff] }
  0xd6   :  { %3296 = vmatprep.subr.msk.mxu0 %vm526_vm0, %v234_v23  ;;  %3330 = vmatprep.subr.msk.mxu1 %vm526_vm0, %v266_v24  ;;  %v334_v23 = vld [vmem:[%s5219_s1 + $0x9f0] sm:$0xff] }
  0xd9   :  { %3297 = vmatpush3.xpose.msk.msra.mxu0 %vm526_vm0, %v218_v25  ;;  %3331 = vmatpush3.xpose.msk.msra.mxu1 %vm526_vm0, %v250_v27 }
  0xda   :  { %3298 = vmatprep.subr.msk.mxu0 %vm526_vm0, %v233_v28  ;;  %3332 = vmatprep.subr.msk.mxu1 %vm526_vm0, %v265_v29 }
  0xdd   :  { %3299 = vmatpush3.xpose.msk.msra.mxu0 %vm526_vm0, %v217_v30  ;;  %3333 = vmatpush3.xpose.msk.msra.mxu1 %vm526_vm0, %v249_v31  ;;  %v286_v31 = vld [vmem:[%s5219_s1 + $0x870] sm:$0xff] }
  0xde   :  { %3300 = vmatprep.subr.msk.mxu0 %vm526_vm0, %v232_v32  ;;  %3334 = vmatprep.subr.msk.mxu1 %vm526_vm0, %v264_v33  ;;  %v4656_v33 = vsub.s32 %v2562_v20, %v4568_v63  ;;  %v324_v20 = vld [vmem:[%s5219_s1 + $0x9a0] sm:$0xff] }
  0xe1   :  { %3301 = vmatpush3.xpose.msk.msra.mxu0 %vm526_vm0, %v216_v34  ;;  %3335 = vmatpush3.xpose.msk.msra.mxu1 %vm526_vm0, %v248_v35  ;;  %v301_v35 = vld [vmem:[%s5219_s1 + $0x8e8] sm:$0xff] }
  0xe2   :  { %3302 = vmatprep.subr.msk.mxu0 %vm526_vm0, %v231_v36  ;;  %3336 = vmatprep.subr.msk.mxu1 %vm526_vm0, %v263_v37  ;;  %v333_v36 = vld [vmem:[%s5219_s1 + $0x9e8] sm:$0xff]  ;;  %v4667_v37 = vld [vmem:[%s5218_s0] sm:$0x3] }
  0xe5   :  { %3303 = vmatpush3.xpose.msk.msra.mxu0 %vm526_vm0, %v215_v38  ;;  %3337 = vmatpush3.xpose.msk.msra.mxu1 %vm526_vm0, %v247_v39 }
  0xe6   :  { %3304 = vmatprep.subr.msk.mxu0 %vm526_vm0, %v230_v40  ;;  %3338 = vmatprep.subr.msk.mxu1 %vm526_vm0, %v262_v41  ;;  %v285_v40 = vld [vmem:[%s5219_s1 + $0x868] sm:$0xff] }
  0xe7   :  { %v317_v41 = vld [vmem:[%s5219_s1 + $0x968] sm:$0xff] }
  0xe9   :  { %3305 = vmatpush3.xpose.msk.msra.mxu0 %vm526_vm0, %v214_v42  ;;  %3339 = vmatpush3.xpose.msk.msra.mxu1 %vm526_vm0, %v246_v43 }
  0xea   :  { %3306 = vmatprep.subr.msk.mxu0 %vm526_vm0, %v229_v44  ;;  %3340 = vmatprep.subr.msk.mxu1 %vm526_vm0, %v261_v45  ;;  %v300_v44 = vld [vmem:[%s5219_s1 + $0x8e0] sm:$0xff] }
  0xeb   :  { %v332_v45 = vld [vmem:[%s5219_s1 + $0x9e0] sm:$0xff] }
  0xed   :  { %3307 = vmatpush3.xpose.msk.msra.mxu0 %vm526_vm0, %v213_v46  ;;  %3341 = vmatpush3.xpose.msk.msra.mxu1 %vm526_vm0, %v245_v47  ;;  %v284_v47 = vld [vmem:[%s5219_s1 + $0x860] sm:$0xff] }
  0xee   :  { %3308 = vmatprep.subr.msk.mxu0 %vm526_vm0, %v228_v48  ;;  %3342 = vmatprep.subr.msk.mxu1 %vm526_vm0, %v260_v49  ;;  %v316_v48 = vld [vmem:[%s5219_s1 + $0x960] sm:$0xff]  ;;  %v299_v49 = vld [vmem:[%s5219_s1 + $0x8d8] sm:$0xff] }
  0xf1   :  { %3309 = vmatpush3.xpose.msk.msra.mxu0 %vm526_vm0, %v212_v50  ;;  %3343 = vmatpush3.xpose.msk.msra.mxu1 %vm526_vm0, %v244_v51  ;;  %v331_v50 = vld [vmem:[%s5219_s1 + $0x9d8] sm:$0xff] }
  0xf2   :  { %3310 = vmatprep.subr.msk.mxu0 %vm526_vm0, %v227_v52  ;;  %3344 = vmatprep.subr.msk.mxu1 %vm526_vm0, %v259_v53  ;;  %v283_v51 = vld [vmem:[%s5219_s1 + $0x858] sm:$0xff]  ;;  %v298_v53 = vld [vmem:[%s5219_s1 + $0x8d0] sm:$0xff] }
  0xf3   :  { %v315_v52 = vld [vmem:[%s5219_s1 + $0x958] sm:$0xff] }
  0xf5   :  { %3311 = vmatpush3.xpose.msk.msra.mxu0 %vm526_vm0, %v211_v54  ;;  %3345 = vmatpush3.xpose.msk.msra.mxu1 %vm526_vm0, %v243_v55  ;;  %v330_v54 = vld [vmem:[%s5219_s1 + $0x9d0] sm:$0xff] }
  0xf6   :  { %3312 = vmatprep.subr.msk.mxu0 %vm526_vm0, %v226_v56  ;;  %3346 = vmatprep.subr.msk.mxu1 %vm526_vm0, %v258_v57  ;;  %v282_v55 = vld [vmem:[%s5219_s1 + $0x850] sm:$0xff]  ;;  %v297_v57 = vld [vmem:[%s5219_s1 + $0x8c8] sm:$0xff] }
  0xf7   :  { %v314_v56 = vld [vmem:[%s5219_s1 + $0x950] sm:$0xff] }
  0xf9   :  { %3313 = vmatpush3.xpose.msk.msra.mxu0 %vm526_vm0, %v210_v59  ;;  %3347 = vmatpush3.xpose.msk.msra.mxu1 %vm526_vm0, %v242_v60  ;;  %v281_v59 = vld [vmem:[%s5219_s1 + $0x848] sm:$0xff] }
  0xfa   :  { %3314 = vmatprep.subr.msk.mxu0 %vm526_vm0, %v225_v61  ;;  %3348 = vmatprep.subr.msk.mxu1 %vm526_vm0, %v257_v62  ;;  %v313_v60 = vld [vmem:[%s5219_s1 + $0x948] sm:$0xff]  ;;  %v296_v61 = vld [vmem:[%s5219_s1 + $0x8c0] sm:$0xff] }
  0xfb   :  { %v328_v62 = vld [vmem:[%s5219_s1 + $0x9c0] sm:$0xff] }
  0xfd   :  { %3315 = vmatpush3.xpose.msk.msra.mxu0 %vm526_vm0, %v209_v0  ;;  %3349 = vmatpush3.xpose.msk.msra.mxu1 %vm526_vm0, %v241_v1  ;;  %v280_v0 = vld [vmem:[%s5219_s1 + $0x840] sm:$0xff] }
  0xfe   :  { %3316 = vmatprep.subr.msk.mxu0 %vm526_vm0, %v224_v2  ;;  %3350 = vmatprep.subr.msk.mxu1 %vm526_vm0, %v256_v3  ;;  %v312_v1 = vld [vmem:[%s5219_s1 + $0x940] sm:$0xff]  ;;  %v295_v2 = vld [vmem:[%s5219_s1 + $0x8b8] sm:$0xff] }
  0xff   :  { %v327_v3 = vld [vmem:[%s5219_s1 + $0x9b8] sm:$0xff] }
 0x101   :  { %3317 = vmatpush3.xpose.msk.msra.mxu0 %vm526_vm0, %v208_v6  ;;  %3351 = vmatpush3.xpose.msk.msra.mxu1 %vm526_vm0, %v240_v7  ;;  %v279_v6 = vld [vmem:[%s5219_s1 + $0x838] sm:$0xff] }
 0x102   :  { %3354 = vmatprep.subr.msk.mxu0 %vm526_vm0, %v303_v9  ;;  %3388 = vmatprep.subr.msk.mxu1 %vm526_vm0, %v335_v10  ;;  %v311_v7 = vld [vmem:[%s5219_s1 + $0x938] sm:$0xff]  ;;  %v294_v9 = vld [vmem:[%s5219_s1 + $0x8b0] sm:$0xff] }
 0x103   :  { %v1748_v24 = vpop.f32.mrf.mxu0  ;;  %v326_v10 = vld [vmem:[%s5219_s1 + $0x9b0] sm:$0xff] }
 0x104   :  { %v1819_v25 = vpop.f32.mrf.mxu1  ;;  %3319 = vmatmul.mubr.msk.f32.vlgmr.msra.gmra.mxu0 %vm526_vm0, %v3640_v26  ;;  %3353 = vmatmul.mubr.msk.f32.vlgmr.msra.gmra.mxu1 %vm526_vm0, %v3640_v26  ;;  %v1749_v27 = vadd.f32 %v1748_v24, %v409_v15  ;;  %v318_v26 = vld [vmem:[%s5219_s1 + $0x970] sm:$0xff]  ;;  %v293_v15 = vld [vmem:[%s5219_s1 + $0x8a8] sm:$0xff]  ;;  %v323_v24 = vld [vmem:[%s5219_s1 + $0x998] sm:$0xff] }
 0x105   :  { %v1820_v28 = vadd.f32 %v1819_v25, %v417_v16  ;;  %3355 = vmatpush3.xpose.msk.msra.mxu0 %vm526_vm0, %v287_v17  ;;  %3389 = vmatpush3.xpose.msk.msra.mxu1 %vm526_vm0, %v319_v18  ;;  %v1750_v29 = vpop.f32.mrf.mxu0  ;;  %v325_v16 = vld [vmem:[%s5219_s1 + $0x9a8] sm:$0xff]  ;;  %v275_v25 = vld [vmem:[%s5219_s1 + $0x818] sm:$0xff] }
 0x106   :  { %v1821_v30 = vpop.f32.mrf.mxu1  ;;  %3356 = vmatprep.subr.msk.mxu0 %vm526_vm0, %v302_v22  ;;  %3390 = vmatprep.subr.msk.mxu1 %vm526_vm0, %v334_v23  ;;  %v1751_v32 = vadd.f32 %v1750_v29, %v413_v19  ;;  %v277_v17 = vld [vmem:[%s5219_s1 + $0x828] sm:$0xff]  ;;  %v292_v19 = vld [vmem:[%s5219_s1 + $0x8a0] sm:$0xff]  ;;  %v291_v23 = vld [vmem:[%s5219_s1 + $0x898] sm:$0xff] }
 0x107   :  { %v1822_v34 = vadd.f32 %v1821_v30, %v421_v21  ;;  %3386 = vmatprep.mubr.msk.f32.mxu0 %vm526_vm0, %v4667_v37  ;;  %3420 = vmatprep.mubr.msk.f32.mxu1 %vm526_vm0, %v4667_v37  ;;  %v309_v18 = vld [vmem:[%s5219_s1 + $0x928] sm:$0xff]  ;;  %v276_v21 = vld [vmem:[%s5219_s1 + $0x820] sm:$0xff]  ;;  %v322_v29 = vld [vmem:[%s5219_s1 + $0x990] sm:$0xff] }
 0x108   :  { %v2558_v38 = vcombine.low %v1749_v27, %v1751_v32  ;;  %v308_v22 = vld [vmem:[%s5219_s1 + $0x920] sm:$0xff]  ;;  %v307_v27 = vld [vmem:[%s5219_s1 + $0x918] sm:$0xff]  ;;  %v274_v30 = vld [vmem:[%s5219_s1 + $0x810] sm:$0xff] }
 0x109   :  { %v2559_v39 = vcombine.low %v1820_v28, %v1822_v34  ;;  %3357 = vmatpush3.xpose.msk.msra.mxu0 %vm526_vm0, %v286_v31  ;;  %3391 = vmatpush3.xpose.msk.msra.mxu1 %vm526_vm0, %v318_v26  ;;  %v290_v28 = vld [vmem:[%s5219_s1 + $0x890] sm:$0xff]  ;;  %v289_v26 = vld [vmem:[%s5219_s1 + $0x888] sm:$0xff] }
 0x10a   :  { %3358 = vmatprep.subr.msk.mxu0 %vm526_vm0, %v301_v35  ;;  %3392 = vmatprep.subr.msk.mxu1 %vm526_vm0, %v333_v36  ;;  %v2566_v42 = vrot.slane %v2558_v38, %v4656_v33  ;;  %v306_v31 = vld [vmem:[%s5219_s1 + $0x910] sm:$0xff]  ;;  %v321_v32 = vld [vmem:[%s5219_s1 + $0x988] sm:$0xff]  ;;  %v288_v36 = vld [vmem:[%s5219_s1 + $0x880] sm:$0xff] }
 0x10b   :  { %v2573_v43 = vrot.slane %v2559_v39, %v4656_v33  ;;  %v273_v34 = vld [vmem:[%s5219_s1 + $0x808] sm:$0xff]  ;;  %v320_v38 = vld [vmem:[%s5219_s1 + $0x980] sm:$0xff]  ;;  %v4886_v39 = vsub.s32 4, %v4568_v63 }
 0x10c   :  { %v305_v35 = vld [vmem:[%s5219_s1 + $0x908] sm:$0xff] }
 0x10d   :  { %v2574_v46 = vcombine.low %v2566_v42, %v2573_v43  ;;  %3359 = vmatpush3.xpose.msk.msra.mxu0 %vm526_vm0, %v285_v40  ;;  %3393 = vmatpush3.xpose.msk.msra.mxu1 %vm526_vm0, %v317_v41  ;;  %v4889_v40 = vsub.s32 6, %v4568_v63  ;;  %v272_v41 = vld [vmem:[%s5219_s1 + $0x800] sm:$0xff]  ;;  %v367_v43 = vld [vmem:[%s5219_s1 + $0xaf8] sm:$0xff] }
 0x10e   :  { %3360 = vmatprep.subr.msk.mxu0 %vm526_vm0, %v300_v44  ;;  %3394 = vmatprep.subr.msk.mxu1 %vm526_vm0, %v332_v45  ;;  %v304_v42 = vld [vmem:[%s5219_s1 + $0x900] sm:$0xff]  ;;  %v399_v44 = vld [vmem:[%s5219_s1 + $0xbf8] sm:$0xff]  ;;  %v4906_v45 = vsub.s32 5, %v4568_v63 }
 0x10f   :  { %2666 = vst [vmem:[#allocation2] sm:$0xff] %v2574_v46  ;;  %v4909_v46 = vsub.s32 7, %v4568_v63  ;;  %v383_v63 = vld [vmem:[%s5219_s1 + $0xb78] sm:$0xff] }
 0x111   :  { %3361 = vmatpush3.xpose.msk.msra.mxu0 %vm526_vm0, %v284_v47  ;;  %3395 = vmatpush3.xpose.msk.msra.mxu1 %vm526_vm0, %v316_v48  ;;  %v425_v47 = vrot.slane %v4603_v8, %v4886_v39  ;;  %v433_v48 = vrot.slane %v4603_v8, %v4889_v40 }
 0x112   :  { %3362 = vmatprep.subr.msk.mxu0 %vm526_vm0, %v299_v49  ;;  %3396 = vmatprep.subr.msk.mxu1 %vm526_vm0, %v331_v50  ;;  %v351_v49 = vld [vmem:[%s5219_s1 + $0xa78] sm:$0xff]  ;;  %v429_v50 = vrot.slane %v4603_v8, %v4906_v45 }
 0x115   :  { %3363 = vmatpush3.xpose.msk.msra.mxu0 %vm526_vm0, %v283_v51  ;;  %3397 = vmatpush3.xpose.msk.msra.mxu1 %vm526_vm0, %v315_v52  ;;  %v437_v51 = vrot.slane %v4603_v8, %v4909_v46  ;;  %v366_v52 = vld [vmem:[%s5219_s1 + $0xaf0] sm:$0xff] }
 0x116   :  { %3364 = vmatprep.subr.msk.mxu0 %vm526_vm0, %v298_v53  ;;  %3398 = vmatprep.subr.msk.mxu1 %vm526_vm0, %v330_v54  ;;  %v398_v53 = vld [vmem:[%s5219_s1 + $0xbf0] sm:$0xff] }
 0x119   :  { %3365 = vmatpush3.xpose.msk.msra.mxu0 %vm526_vm0, %v282_v55  ;;  %3399 = vmatpush3.xpose.msk.msra.mxu1 %vm526_vm0, %v314_v56 }
 0x11a   :  { %3366 = vmatprep.subr.msk.mxu0 %vm526_vm0, %v297_v57  ;;  %3400 = vmatprep.subr.msk.mxu1 %vm526_vm0, %v329_v58 }
 0x11d   :  { %3367 = vmatpush3.xpose.msk.msra.mxu0 %vm526_vm0, %v281_v59  ;;  %3401 = vmatpush3.xpose.msk.msra.mxu1 %vm526_vm0, %v313_v60  ;;  %v350_v59 = vld [vmem:[%s5219_s1 + $0xa70] sm:$0xff] }
 0x11e   :  { %3368 = vmatprep.subr.msk.mxu0 %vm526_vm0, %v296_v61  ;;  %3402 = vmatprep.subr.msk.mxu1 %vm526_vm0, %v328_v62  ;;  %v382_v60 = vld [vmem:[%s5219_s1 + $0xb70] sm:$0xff] }
 0x121   :  { %3369 = vmatpush3.xpose.msk.msra.mxu0 %vm526_vm0, %v280_v0  ;;  %3403 = vmatpush3.xpose.msk.msra.mxu1 %vm526_vm0, %v312_v1  ;;  %v365_v0 = vld [vmem:[%s5219_s1 + $0xae8] sm:$0xff] }
 0x122   :  { %3370 = vmatprep.subr.msk.mxu0 %vm526_vm0, %v295_v2  ;;  %3404 = vmatprep.subr.msk.mxu1 %vm526_vm0, %v327_v3  ;;  %v397_v1 = vld [vmem:[%s5219_s1 + $0xbe8] sm:$0xff] }
 0x125   :  { %3371 = vmatpush3.xpose.msk.msra.mxu0 %vm526_vm0, %v279_v6  ;;  %3405 = vmatpush3.xpose.msk.msra.mxu1 %vm526_vm0, %v311_v7  ;;  %v349_v6 = vld [vmem:[%s5219_s1 + $0xa68] sm:$0xff] }
 0x126   :  { %3372 = vmatprep.subr.msk.mxu0 %vm526_vm0, %v294_v9  ;;  %3406 = vmatprep.subr.msk.mxu1 %vm526_vm0, %v326_v10  ;;  %v381_v7 = vld [vmem:[%s5219_s1 + $0xb68] sm:$0xff] }
 0x129   :  { %3373 = vmatpush3.xpose.msk.msra.mxu0 %vm526_vm0, %v278_v12  ;;  %3407 = vmatpush3.xpose.msk.msra.mxu1 %vm526_vm0, %v310_v13  ;;  %v364_v12 = vld [vmem:[%s5219_s1 + $0xae0] sm:$0xff] }
 0x12a   :  { %3374 = vmatprep.subr.msk.mxu0 %vm526_vm0, %v293_v15  ;;  %3408 = vmatprep.subr.msk.mxu1 %vm526_vm0, %v325_v16  ;;  %v396_v13 = vld [vmem:[%s5219_s1 + $0xbe0] sm:$0xff] }
 0x12b   :  { %v348_v16 = vld [vmem:[%s5219_s1 + $0xa60] sm:$0xff] }
 0x12d   :  { %3375 = vmatpush3.xpose.msk.msra.mxu0 %vm526_vm0, %v277_v17  ;;  %3409 = vmatpush3.xpose.msk.msra.mxu1 %vm526_vm0, %v309_v18  ;;  %v380_v17 = vld [vmem:[%s5219_s1 + $0xb60] sm:$0xff]  ;;  %v363_v18 = vld [vmem:[%s5219_s1 + $0xad8] sm:$0xff] }
 0x12e   :  { %3376 = vmatprep.subr.msk.mxu0 %vm526_vm0, %v292_v19  ;;  %3410 = vmatprep.subr.msk.mxu1 %vm526_vm0, %v324_v20  ;;  %v395_v19 = vld [vmem:[%s5219_s1 + $0xbd8] sm:$0xff] }
 0x12f   :  { %v347_v20 = vld [vmem:[%s5219_s1 + $0xa58] sm:$0xff] }
 0x131   :  { %3377 = vmatpush3.xpose.msk.msra.mxu0 %vm526_vm0, %v276_v21  ;;  %3411 = vmatpush3.xpose.msk.msra.mxu1 %vm526_vm0, %v308_v22  ;;  %v379_v21 = vld [vmem:[%s5219_s1 + $0xb58] sm:$0xff]  ;;  %v362_v22 = vld [vmem:[%s5219_s1 + $0xad0] sm:$0xff] }
 0x132   :  { %3378 = vmatprep.subr.msk.mxu0 %vm526_vm0, %v291_v23  ;;  %3412 = vmatprep.subr.msk.mxu1 %vm526_vm0, %v323_v24  ;;  %v394_v23 = vld [vmem:[%s5219_s1 + $0xbd0] sm:$0xff] }
 0x133   :  { %v346_v24 = vld [vmem:[%s5219_s1 + $0xa50] sm:$0xff] }
 0x135   :  { %3379 = vmatpush3.xpose.msk.msra.mxu0 %vm526_vm0, %v275_v25  ;;  %3413 = vmatpush3.xpose.msk.msra.mxu1 %vm526_vm0, %v307_v27  ;;  %v378_v25 = vld [vmem:[%s5219_s1 + $0xb50] sm:$0xff]  ;;  %v361_v27 = vld [vmem:[%s5219_s1 + $0xac8] sm:$0xff] }
 0x136   :  { %3380 = vmatprep.subr.msk.mxu0 %vm526_vm0, %v290_v28  ;;  %3414 = vmatprep.subr.msk.mxu1 %vm526_vm0, %v322_v29  ;;  %v393_v28 = vld [vmem:[%s5219_s1 + $0xbc8] sm:$0xff] }
 0x137   :  { %v345_v29 = vld [vmem:[%s5219_s1 + $0xa48] sm:$0xff] }
 0x139   :  { %3381 = vmatpush3.xpose.msk.msra.mxu0 %vm526_vm0, %v274_v30  ;;  %3415 = vmatpush3.xpose.msk.msra.mxu1 %vm526_vm0, %v306_v31  ;;  %v377_v30 = vld [vmem:[%s5219_s1 + $0xb48] sm:$0xff]  ;;  %v360_v31 = vld [vmem:[%s5219_s1 + $0xac0] sm:$0xff] }
 0x13a   :  { %3382 = vmatprep.subr.msk.mxu0 %vm526_vm0, %v289_v26  ;;  %3416 = vmatprep.subr.msk.mxu1 %vm526_vm0, %v321_v32  ;;  %v392_v26 = vld [vmem:[%s5219_s1 + $0xbc0] sm:$0xff] }
 0x13b   :  { %v344_v32 = vld [vmem:[%s5219_s1 + $0xa40] sm:$0xff] }
 0x13d   :  { %3383 = vmatpush3.xpose.msk.msra.mxu0 %vm526_vm0, %v273_v34  ;;  %3417 = vmatpush3.xpose.msk.msra.mxu1 %vm526_vm0, %v305_v35  ;;  %v376_v34 = vld [vmem:[%s5219_s1 + $0xb40] sm:$0xff]  ;;  %v359_v35 = vld [vmem:[%s5219_s1 + $0xab8] sm:$0xff] }
 0x13e   :  { %3384 = vmatprep.subr.msk.mxu0 %vm526_vm0, %v288_v36  ;;  %3418 = vmatprep.subr.msk.mxu1 %vm526_vm0, %v320_v38  ;;  %v391_v36 = vld [vmem:[%s5219_s1 + $0xbb8] sm:$0xff] }
 0x13f   :  { %v343_v38 = vld [vmem:[%s5219_s1 + $0xa38] sm:$0xff] }
 0x141   :  { %3385 = vmatpush3.xpose.msk.msra.mxu0 %vm526_vm0, %v272_v41  ;;  %3419 = vmatpush3.xpose.msk.msra.mxu1 %vm526_vm0, %v304_v42  ;;  %v375_v41 = vld [vmem:[%s5219_s1 + $0xb38] sm:$0xff]  ;;  %v358_v42 = vld [vmem:[%s5219_s1 + $0xab0] sm:$0xff] }
 0x142   :  { %3422 = vmatprep.subr.msk.mxu0 %vm526_vm0, %v367_v43  ;;  %3456 = vmatprep.subr.msk.mxu1 %vm526_vm0, %v399_v44  ;;  %v390_v43 = vld [vmem:[%s5219_s1 + $0xbb0] sm:$0xff] }
 0x143   :  { %v342_v44 = vld [vmem:[%s5219_s1 + $0xa30] sm:$0xff] }
 0x144   :  { %v1890_v54 = vpop.f32.mrf.mxu0  ;;  %v1961_v55 = vpop.f32.mrf.mxu1  ;;  %3387 = vmatmul.mubr.msk.f32.vlgmr.msra.gmra.mxu0 %vm526_vm0, %v4667_v37  ;;  %3421 = vmatmul.mubr.msk.f32.vlgmr.msra.gmra.mxu1 %vm526_vm0, %v4667_v37 }
 0x145   :  { %v1891_v56 = vadd.f32 %v1890_v54, %v425_v47  ;;  %v1962_v57 = vadd.f32 %v1961_v55, %v433_v48  ;;  %3423 = vmatpush3.xpose.msk.msra.mxu0 %vm526_vm0, %v351_v49  ;;  %3457 = vmatpush3.xpose.msk.msra.mxu1 %vm526_vm0, %v383_v63  ;;  %v374_v47 = vld [vmem:[%s5219_s1 + $0xb30] sm:$0xff]  ;;  %v357_v48 = vld [vmem:[%s5219_s1 + $0xaa8] sm:$0xff]  ;;  %v372_v54 = vld [vmem:[%s5219_s1 + $0xb20] sm:$0xff] }
 0x146   :  { %v1892_v8 = vpop.f32.mrf.mxu0  ;;  %v1963_v58 = vpop.f32.mrf.mxu1  ;;  %3424 = vmatprep.subr.msk.mxu0 %vm526_vm0, %v366_v52  ;;  %3458 = vmatprep.subr.msk.mxu1 %vm526_vm0, %v398_v53  ;;  %v389_v49 = vld [vmem:[%s5219_s1 + $0xba8] sm:$0xff]  ;;  %v388_v52 = vld [vmem:[%s5219_s1 + $0xba0] sm:$0xff]  ;;  %v355_v55 = vld [vmem:[%s5219_s1 + $0xa98] sm:$0xff] }
 0x147   :  { %v1893_v61 = vadd.f32 %v1892_v8, %v429_v50  ;;  %v1964_v62 = vadd.f32 %v1963_v58, %v437_v51  ;;  %3454 = vmatprep.mubr.msk.f32.mxu0 %vm526_vm0, %v4667_v37  ;;  %3488 = vmatprep.mubr.msk.f32.mxu1 %vm526_vm0, %v4667_v37  ;;  %v341_v63 = vld [vmem:[%s5219_s1 + $0xa28] sm:$0xff]  ;;  %v356_v51 = vld [vmem:[%s5219_s1 + $0xaa0] sm:$0xff]  ;;  %v371_v8 = vld [vmem:[%s5219_s1 + $0xb18] sm:$0xff] }
 0x148   :  { %v373_v50 = vld [vmem:[%s5219_s1 + $0xb28] sm:$0xff]  ;;  %v340_v53 = vld [vmem:[%s5219_s1 + $0xa20] sm:$0xff]  ;;  %v354_v58 = vld [vmem:[%s5219_s1 + $0xa90] sm:$0xff] }
 0x149   :  { %v2575_v2 = vcombine.low %v1891_v56, %v1893_v61  ;;  %v2576_v3 = vcombine.low %v1962_v57, %v1964_v62  ;;  %3425 = vmatpush3.xpose.msk.msra.mxu0 %vm526_vm0, %v350_v59  ;;  %3459 = vmatpush3.xpose.msk.msra.mxu1 %vm526_vm0, %v382_v60  ;;  %v387_v56 = vld [vmem:[%s5219_s1 + $0xb98] sm:$0xff]  ;;  %v386_v59 = vld [vmem:[%s5219_s1 + $0xb90] sm:$0xff]  ;;  %v353_v62 = vld [vmem:[%s5219_s1 + $0xa88] sm:$0xff] }
 0x14a   :  { %3426 = vmatprep.subr.msk.mxu0 %vm526_vm0, %v365_v0  ;;  %3460 = vmatprep.subr.msk.mxu1 %vm526_vm0, %v397_v1  ;;  %v339_v57 = vld [vmem:[%s5219_s1 + $0xa18] sm:$0xff]  ;;  %v338_v60 = vld [vmem:[%s5219_s1 + $0xa10] sm:$0xff]  ;;  %v385_v0 = vld [vmem:[%s5219_s1 + $0xb88] sm:$0xff] }
 0x14b   :  { %v2583_v9 = vrot.slane %v2575_v2, %v4656_v33  ;;  %v2590_v10 = vrot.slane %v2576_v3, %v4656_v33  ;;  %v370_v61 = vld [vmem:[%s5219_s1 + $0xb10] sm:$0xff]  ;;  %v337_v1 = vld [vmem:[%s5219_s1 + $0xa08] sm:$0xff]  ;;  %v352_v3 = vld [vmem:[%s5219_s1 + $0xa80] sm:$0xff] }
 0x14c   :  { %v369_v2 = vld [vmem:[%s5219_s1 + $0xb08] sm:$0xff] }
 0x14d   :  { %v2591_v15 = vcombine.low %v2583_v9, %v2590_v10  ;;  %3427 = vmatpush3.xpose.msk.msra.mxu0 %vm526_vm0, %v349_v6  ;;  %3461 = vmatpush3.xpose.msk.msra.mxu1 %vm526_vm0, %v381_v7  ;;  %v384_v6 = vld [vmem:[%s5219_s1 + $0xb80] sm:$0xff]  ;;  %v401_v10 = vld [vmem:[%s5220_s2 + $0x8] sm:$0xff] }
 0x14e   :  { %3428 = vmatprep.subr.msk.mxu0 %vm526_vm0, %v364_v12  ;;  %3462 = vmatprep.subr.msk.mxu1 %vm526_vm0, %v396_v13  ;;  %v336_v7 = vld [vmem:[%s5219_s1 + $0xa00] sm:$0xff]  ;;  %v441_v12 = vrot.slane %v401_v10, %v4587_v4  ;;  %v449_v13 = vrot.slane %v401_v10, %v4590_v5 }
 0x14f   :  { %2667 = vst [vmem:[#allocation2 + $0x8] sm:$0xff] %v2591_v15  ;;  %v368_v9 = vld [vmem:[%s5219_s1 + $0xb00] sm:$0xff]  ;;  %v445_v15 = vrot.slane %v401_v10, %v4612_v11 }
 0x151   :  { %3429 = vmatpush3.xpose.msk.msra.mxu0 %vm526_vm0, %v348_v16  ;;  %3463 = vmatpush3.xpose.msk.msra.mxu1 %vm526_vm0, %v380_v17  ;;  %v453_v16 = vrot.slane %v401_v10, %v4615_v14 }
 0x152   :  { %3430 = vmatprep.subr.msk.mxu0 %vm526_vm0, %v363_v18  ;;  %3464 = vmatprep.subr.msk.mxu1 %vm526_vm0, %v395_v19 }
 0x155   :  { %3431 = vmatpush3.xpose.msk.msra.mxu0 %vm526_vm0, %v347_v20  ;;  %3465 = vmatpush3.xpose.msk.msra.mxu1 %vm526_vm0, %v379_v21 }
 0x156   :  { %3432 = vmatprep.subr.msk.mxu0 %vm526_vm0, %v362_v22  ;;  %3466 = vmatprep.subr.msk.mxu1 %vm526_vm0, %v394_v23 }
 0x159   :  { %3433 = vmatpush3.xpose.msk.msra.mxu0 %vm526_vm0, %v346_v24  ;;  %3467 = vmatpush3.xpose.msk.msra.mxu1 %vm526_vm0, %v378_v25 }
 0x15a   :  { %3434 = vmatprep.subr.msk.mxu0 %vm526_vm0, %v361_v27  ;;  %3468 = vmatprep.subr.msk.mxu1 %vm526_vm0, %v393_v28 }
 0x15d   :  { %3435 = vmatpush3.xpose.msk.msra.mxu0 %vm526_vm0, %v345_v29  ;;  %3469 = vmatpush3.xpose.msk.msra.mxu1 %vm526_vm0, %v377_v30 }
 0x15e   :  { %3436 = vmatprep.subr.msk.mxu0 %vm526_vm0, %v360_v31  ;;  %3470 = vmatprep.subr.msk.mxu1 %vm526_vm0, %v392_v26  ;;  %v457_v31 = vrot.slane %v401_v10, %v4886_v39  ;;  %v465_v26 = vrot.slane %v401_v10, %v4889_v40 }
 0x161   :  { %3437 = vmatpush3.xpose.msk.msra.mxu0 %vm526_vm0, %v344_v32  ;;  %3471 = vmatpush3.xpose.msk.msra.mxu1 %vm526_vm0, %v376_v34  ;;  %v469_v32 = vrot.slane %v401_v10, %v4909_v46 }
 0x162   :  { %3438 = vmatprep.subr.msk.mxu0 %vm526_vm0, %v359_v35  ;;  %3472 = vmatprep.subr.msk.mxu1 %vm526_vm0, %v391_v36 }
 0x165   :  { %3439 = vmatpush3.xpose.msk.msra.mxu0 %vm526_vm0, %v343_v38  ;;  %3473 = vmatpush3.xpose.msk.msra.mxu1 %vm526_vm0, %v375_v41 }
 0x166   :  { %3440 = vmatprep.subr.msk.mxu0 %vm526_vm0, %v358_v42  ;;  %3474 = vmatprep.subr.msk.mxu1 %vm526_vm0, %v390_v43 }
 0x169   :  { %3441 = vmatpush3.xpose.msk.msra.mxu0 %vm526_vm0, %v342_v44  ;;  %3475 = vmatpush3.xpose.msk.msra.mxu1 %vm526_vm0, %v374_v47 }
 0x16a   :  { %3442 = vmatprep.subr.msk.mxu0 %vm526_vm0, %v357_v48  ;;  %3476 = vmatprep.subr.msk.mxu1 %vm526_vm0, %v389_v49 }
 0x16d   :  { %3443 = vmatpush3.xpose.msk.msra.mxu0 %vm526_vm0, %v341_v63  ;;  %3477 = vmatpush3.xpose.msk.msra.mxu1 %vm526_vm0, %v373_v50 }
 0x16e   :  { %3444 = vmatprep.subr.msk.mxu0 %vm526_vm0, %v356_v51  ;;  %3478 = vmatprep.subr.msk.mxu1 %vm526_vm0, %v388_v52  ;;  %v402_v51 = vld [vmem:[%s5220_s2 + $0x10] sm:$0xff]  ;;  %s3516_s2 = smov [#allocation2]  }
 0x16f   :  { %v473_v52 = vrot.slane %v402_v51, %v4587_v4  ;;  %s2678_s24 = sshll.u32 %s3516_s2, 4  ;;  %s2679_s24 = int_to_ptr.vmem [resolvable:$true] %s2678_s24 }
 0x170   :  { %s3493_s25 = scalar_lea.vmem %s2679_s24, 768  ;;  %p3498_p1 = scmp.lt.s32.totalorder %s2679_s24, %s2679_s24 }
 0x171   :  { %3445 = vmatpush3.xpose.msk.msra.mxu0 %vm526_vm0, %v340_v53  ;;  %3479 = vmatpush3.xpose.msk.msra.mxu1 %vm526_vm0, %v372_v54  ;;  %v481_v53 = vrot.slane %v402_v51, %v4590_v5  ;;  %v477_v54 = vrot.slane %v402_v51, %v4612_v11  ;;  %v489_v5 = vrot.slane %v402_v51, %v4886_v39  ;;  %p3494_p0 = scmp.ne.s32.totalorder %s2679_s24, %s3493_s25  ;;  %p3499_p2 = scmp.lt.s32.totalorder %s3493_s25, %s3493_s25 }
 0x172   :  { %3446 = vmatprep.subr.msk.mxu0 %vm526_vm0, %v355_v55  ;;  %3480 = vmatprep.subr.msk.mxu1 %vm526_vm0, %v387_v56  ;;  %v485_v55 = vrot.slane %v402_v51, %v4615_v14  ;;  %v497_v11 = vrot.slane %v402_v51, %v4889_v40  ;;  %v493_v14 = vrot.slane %v402_v51, %v4906_v45 }
 0x173   :  { %p3500_p3 = por %p3499_p2, %p3498_p1 }
 0x175   :  { %3447 = vmatpush3.xpose.msk.msra.mxu0 %vm526_vm0, %v339_v57  ;;  %3481 = vmatpush3.xpose.msk.msra.mxu1 %vm526_vm0, %v371_v8  ;;  %p3501_p4 = pnand %p3500_p3, %p3494_p0 }
 0x176   :  { %3448 = vmatprep.subr.msk.mxu0 %vm526_vm0, %v354_v58  ;;  %3482 = vmatprep.subr.msk.mxu1 %vm526_vm0, %v386_v59 }
 0x179   :  { %3449 = vmatpush3.xpose.msk.msra.mxu0 %vm526_vm0, %v338_v60  ;;  %3483 = vmatpush3.xpose.msk.msra.mxu1 %vm526_vm0, %v370_v61 }
 0x17a   :  { %3450 = vmatprep.subr.msk.mxu0 %vm526_vm0, %v353_v62  ;;  %3484 = vmatprep.subr.msk.mxu1 %vm526_vm0, %v385_v0 }
 0x17d   :  { %3451 = vmatpush3.xpose.msk.msra.mxu0 %vm526_vm0, %v337_v1  ;;  %3485 = vmatpush3.xpose.msk.msra.mxu1 %vm526_vm0, %v369_v2 }
 0x17e   :  { %3452 = vmatprep.subr.msk.mxu0 %vm526_vm0, %v352_v3  ;;  %3486 = vmatprep.subr.msk.mxu1 %vm526_vm0, %v384_v6  ;;  %v501_v6 = vrot.slane %v402_v51, %v4909_v46 }
 0x181   :  { %3453 = vmatpush3.xpose.msk.msra.mxu0 %vm526_vm0, %v336_v7  ;;  %3487 = vmatpush3.xpose.msk.msra.mxu1 %vm526_vm0, %v368_v9 }
 0x184   :  { %v2032_v17 = vpop.f32.mrf.mxu0  ;;  %v2103_v18 = vpop.f32.mrf.mxu1  ;;  %3455 = vmatmul.mubr.msk.f32.vlgmr.msra.gmra.mxu0 %vm526_vm0, %v4667_v37  ;;  %3489 = vmatmul.mubr.msk.f32.vlgmr.msra.gmra.mxu1 %vm526_vm0, %v4667_v37  ;;  %v461_v37 = vrot.slane %v401_v10, %v4906_v45 }
 0x185   :  { %v2033_v19 = vadd.f32 %v2032_v17, %v441_v12  ;;  %v2104_v20 = vadd.f32 %v2103_v18, %v449_v13 }
 0x186   :  { %v2034_v21 = vpop.f32.mrf.mxu0  ;;  %v2105_v22 = vpop.f32.mrf.mxu1 }
 0x187   :  { %v2035_v23 = vadd.f32 %v2034_v21, %v445_v15  ;;  %v2106_v24 = vadd.f32 %v2105_v22, %v453_v16 }
 0x189   :  { %v2592_v25 = vcombine.low %v2033_v19, %v2035_v23  ;;  %v2593_v27 = vcombine.low %v2104_v20, %v2106_v24 }
 0x18b   :  { %v2600_v28 = vrot.slane %v2592_v25, %v4656_v33  ;;  %v2607_v29 = vrot.slane %v2593_v27, %v4656_v33 }
 0x18d   :  { %v2608_v30 = vcombine.low %v2600_v28, %v2607_v29 }
 0x18f   :  { %2668 = vst [vmem:[#allocation2 + $0x10] sm:$0xff] %v2608_v30 }
 0x1c4   :  { %v2174_v34 = vpop.f32.mrf.mxu0  ;;  %v2245_v35 = vpop.f32.mrf.mxu1 }
 0x1c5   :  { %v2175_v36 = vadd.f32 %v2174_v34, %v457_v31  ;;  %v2246_v38 = vadd.f32 %v2245_v35, %v465_v26 }
 0x1c6   :  { %v2176_v41 = vpop.f32.mrf.mxu0  ;;  %v2247_v42 = vpop.f32.mrf.mxu1 }
 0x1c7   :  { %v2177_v43 = vadd.f32 %v2176_v41, %v461_v37  ;;  %v2248_v44 = vadd.f32 %v2247_v42, %v469_v32 }
 0x1c9   :  { %v2609_v47 = vcombine.low %v2175_v36, %v2177_v43  ;;  %v2610_v48 = vcombine.low %v2246_v38, %v2248_v44 }
 0x1cb   :  { %v2617_v49 = vrot.slane %v2609_v47, %v4656_v33  ;;  %v2624_v63 = vrot.slane %v2610_v48, %v4656_v33 }
 0x1cd   :  { %v2625_v50 = vcombine.low %v2617_v49, %v2624_v63 }
 0x1cf   :  { %2669 = vst [vmem:[#allocation2 + $0x18] sm:$0xff] %v2625_v50 }
 0x204   :  { %v2316_v56 = vpop.f32.mrf.mxu0  ;;  %v2387_v57 = vpop.f32.mrf.mxu1 }
 0x205   :  { %v2317_v8 = vadd.f32 %v2316_v56, %v473_v52  ;;  %v2388_v58 = vadd.f32 %v2387_v57, %v481_v53 }
 0x206   :  { %v2318_v59 = vpop.f32.mrf.mxu0  ;;  %v2389_v60 = vpop.f32.mrf.mxu1 }
 0x207   :  { %v2319_v61 = vadd.f32 %v2318_v59, %v477_v54  ;;  %v2390_v62 = vadd.f32 %v2389_v60, %v485_v55 }
 0x209   :  { %v2626_v0 = vcombine.low %v2317_v8, %v2319_v61  ;;  %v2627_v1 = vcombine.low %v2388_v58, %v2390_v62 }
 0x20b   :  { %v2634_v2 = vrot.slane %v2626_v0, %v4656_v33  ;;  %v2641_v4 = vrot.slane %v2627_v1, %v4656_v33 }
 0x20d   :  { %v2642_v3 = vcombine.low %v2634_v2, %v2641_v4 }
 0x20f   :  { %2670 = vst [vmem:[#allocation2 + $0x20] sm:$0xff] %v2642_v3 }
 0x244   :  { %v2458_v7 = vpop.f32.mrf.mxu0  ;;  %v2529_v9 = vpop.f32.mrf.mxu1 }
 0x245   :  { %v2459_v13 = vadd.f32 %v2458_v7, %v489_v5  ;;  %v2530_v15 = vadd.f32 %v2529_v9, %v497_v11 }
 0x246   :  { %v2460_v10 = vpop.f32.mrf.mxu0  ;;  %v2531_v12 = vpop.f32.mrf.mxu1 }
 0x247   :  { %v2461_v16 = vadd.f32 %v2460_v10, %v493_v14  ;;  %v2532_v17 = vadd.f32 %v2531_v12, %v501_v6 }
 0x249   :  { %v2643_v18 = vcombine.low %v2459_v13, %v2461_v16  ;;  %v2644_v19 = vcombine.low %v2530_v15, %v2532_v17 }
 0x24b   :  { %v2651_v39 = vrot.slane %v2643_v18, %v4656_v33  ;;  %v2658_v40 = vrot.slane %v2644_v19, %v4656_v33 }
 0x24d   :  { %v2659_v20 = vcombine.low %v2651_v39, %v2658_v40 }
 0x24f   :  { %2671 = vst [vmem:[#allocation2 + $0x28] sm:$0xff] %v2659_v20 }
 0x250   :  { %3504 = shalt.err (!%p3501_p4)
}
 0x251   :  { %2681 = dma.vmem_to_hbm [thread:$0]  %s2679_s24, 768, %s5221_s3, [#allocation3]  }
 0x252   :  { %3513 = dma.done.wait [#allocation3], 768  }
 0x253   :  { %3514 = vsyncadd [#allocation3], 4294966528 }
 0x254   :  { %2685 = vsyncpa [#allocation3], 1 }

</bundles_post_ra>
